<compile_context>
chip_gen: v7x
topology: tpu7x:2x2x1
jax: 0.10.0
libtpu: 0.0.40
codegen_flags: <defaults>
</compile_context>

<pallas_src>
import math
import functools

import jax
import jax.numpy as jnp
import numpy as np
from jax import lax
from jax.experimental import pallas as pl
from jax.experimental.pallas import tpu as pltpu  # noqa: F401  (TPU backend assumed)

LN_EPS = 1e-12          # HF BertLayerNorm default eps
LEAKY_SLOPE = 0.01      # nn.LeakyReLU default negative_slope
LANE = 128              # lane width used for the packed parameter slab


# ----------------------------- math shared by kernel & reference ----------------------------- #
def _gelu(x):
    # TODO(synk): HF Bert's default "gelu" is the exact erf form; tanh approximation used
    # here (erf has no guaranteed Mosaic lowering).
    c = math.sqrt(2.0 / math.pi)
    return 0.5 * x * (1.0 + jnp.tanh(c * (x + 0.044715 * x * x * x)))


def _layernorm(x, g, b, eps=LN_EPS):
    mu = jnp.mean(x, axis=-1, keepdims=True)
    var = jnp.mean((x - mu) ** 2, axis=-1, keepdims=True)
    return (x - mu) * lax.rsqrt(var + eps) * g + b


# ----------------------------------- parameter slab packing ---------------------------------- #
class _SlabPacker:
    """Packs weights/biases into one (rows, 128) f32 slab; returns static (row, col, nr, nc)."""

    def __init__(self):
        self._blocks = []
        self._cursor = 0

    def add_matrix(self, w):
        w = np.asarray(w, np.float32)
        r, c = int(w.shape[0]), int(w.shape[1])
        rp = ((r + 7) // 8) * 8                      # keep matrix row offsets 8-aligned
        blk = np.zeros((rp, LANE), np.float32)
        blk[:r, :c] = w
        meta = (self._cursor, 0, r, c)
        self._blocks.append(blk)
        self._cursor += rp
        return meta

    def add_vectors(self, vecs):
        """Pack several (1, c) vectors into shared 8-row blocks (one row each)."""
        n = len(vecs)
        rp = ((n + 7) // 8) * 8
        blk = np.zeros((rp, LANE), np.float32)
        metas = []
        for i, v in enumerate(vecs):
            v = np.asarray(v, np.float32).reshape(-1)
            c = int(v.shape[0])
            blk[i, :c] = v
            metas.append((self._cursor + i, 0, 1, c))
        self._blocks.append(blk)
        self._cursor += rp
        return metas

    def finish(self):
        return jnp.asarray(np.concatenate(self._blocks, axis=0))


def pack_params(params):
    """Host-side relayout: fuse [wq|wk|wv] and pack every parameter into one slab."""
    pk = _SlabPacker()
    layer_metas = []
    for lp in params['layers']:
        wqkv = np.concatenate([np.asarray(lp['wq']), np.asarray(lp['wk']),
                               np.asarray(lp['wv'])], axis=1)
        bqkv = np.concatenate([np.asarray(lp['bq']), np.asarray(lp['bk']),
                               np.asarray(lp['bv'])], axis=1)
        m = {}
        m['wqkv'] = pk.add_matrix(wqkv)
        m['wo'] = pk.add_matrix(lp['wo'])
        m['wi'] = pk.add_matrix(lp['wi'])
        m['wo2'] = pk.add_matrix(lp['wo2'])
        (m['bqkv'], m['bo'], m['ln1_g'], m['ln1_b'],
         m['bi'], m['bo2'], m['ln2_g'], m['ln2_b']) = pk.add_vectors(
            [bqkv, lp['bo'], lp['ln1_g'], lp['ln1_b'],
             lp['bi'], lp['bo2'], lp['ln2_g'], lp['ln2_b']])
        layer_metas.append(m)

    hw = params['head']
    n_lin = len(hw) // 2
    w_metas = [pk.add_matrix(hw[2 * i]) for i in range(n_lin)]
    b_metas = pk.add_vectors([hw[2 * i + 1] for i in range(n_lin)])
    meta = {'layers': layer_metas, 'head': list(zip(w_metas, b_metas))}
    return pk.finish(), meta


def _read(slab_ref, meta):
    r, c, nr, nc = meta
    return slab_ref[r:r + nr, c:c + nc]          # static slice of the resident slab


# --------------------------------- in-kernel layer / head math ------------------------------- #
def _bert_layer(x, slab_ref, m, *, batch, seq, num_heads, head_dim):
    """One BERT layer on the folded (B*S, H) slab; weights read lazily from the slab ref."""
    hidden = num_heads * head_dim

    # fused QKV projection: one (B*S,H)@(H,3H) GEMM (96/128 output lanes vs 8/128 before)
    qkv = jnp.dot(x, _read(slab_ref, m['wqkv']),
                  preferred_element_type=jnp.float32) + _read(slab_ref, m['bqkv'])

    def split_bh(t):     # (B*S, H) -> (B*NH, S, HD) via static slices + stack
        blocks = []
        for b in range(batch):
            for h in range(num_heads):
                blocks.append(t[b * seq:(b + 1) * seq, h * head_dim:(h + 1) * head_dim])
        return jnp.stack(blocks, axis=0)

    q = split_bh(qkv[:, 0 * hidden:1 * hidden])
    k = split_bh(qkv[:, 1 * hidden:2 * hidden])
    v = split_bh(qkv[:, 2 * hidden:3 * hidden])

    # mask-free attention: batch*head is a leading dot_general batch dim, scores (B*NH,S,S)
    s = lax.dot_general(q, k, (((2,), (2,)), ((0,), (0,))),
                        preferred_element_type=jnp.float32) * (1.0 / math.sqrt(head_dim))
    s = s - jnp.max(s, axis=-1, keepdims=True)
    p = jnp.exp(s)
    p = p * pl.reciprocal(jnp.sum(p, axis=-1, keepdims=True), approx=True)   # EUP slot
    ctx = lax.dot_general(p, v, (((2,), (1,)), ((0,), (0,))),
                          preferred_element_type=jnp.float32)                # (B*NH, S, HD)

    # merge heads along lanes -> (B*S, H), then ONE (H,H) output-projection GEMM
    merged = jnp.concatenate(
        [jnp.concatenate([ctx[b * num_heads + h] for h in range(num_heads)], axis=-1)
         for b in range(batch)], axis=0)
    attn = jnp.dot(merged, _read(slab_ref, m['wo']),
                   preferred_element_type=jnp.float32) + _read(slab_ref, m['bo'])

    h1 = _layernorm(x + attn, _read(slab_ref, m['ln1_g']), _read(slab_ref, m['ln1_b']))
    inter = _gelu(jnp.dot(h1, _read(slab_ref, m['wi']),
                          preferred_element_type=jnp.float32) + _read(slab_ref, m['bi']))
    ffn = jnp.dot(inter, _read(slab_ref, m['wo2']),
                  preferred_element_type=jnp.float32) + _read(slab_ref, m['bo2'])
    return _layernorm(h1 + ffn, _read(slab_ref, m['ln2_g']), _read(slab_ref, m['ln2_b']))


# ----------------------------------------- fused kernel -------------------------------------- #
def _fused_kernel(x_ref, slab_ref, out_ref, *, meta, batch, seq, num_heads, head_dim):
    x = x_ref[...]                                   # (B*S, H)
    for lm in meta['layers']:                        # weights loaded lazily inside each layer
        x = _bert_layer(x, slab_ref, lm, batch=batch, seq=seq,
                        num_heads=num_heads, head_dim=head_dim)

    head = meta['head']                              # MLP head: Linear -> LeakyReLU -> (Dropout=id)
    for i, (wm, bm) in enumerate(head):
        x = jnp.dot(x, _read(slab_ref, wm),
                    preferred_element_type=jnp.float32) + _read(slab_ref, bm)
        if i < len(head) - 1:
            x = jnp.where(x > 0, x, LEAKY_SLOPE * x)   # nn.LeakyReLU; Dropout identity (inference)
    # NOTE: out_dim=16 < 128 lanes -> masked stores; negligible at this size (feedback "minor").
    out_ref[...] = x


def _cost_estimate(bs, seq, num_heads, head_dim, meta, slab_size, hidden, out_dim):
    flops, trans = 0, 0
    batch = bs // seq
    for m in meta['layers']:
        for key in ('wqkv', 'wo', 'wi', 'wo2'):
            _, _, kk, nn = m[key]
            flops += 2 * bs * kk * nn
        flops += 2 * 2 * batch * num_heads * seq * seq * head_dim   # scores + context
        inter = m['wi'][3]
        trans += batch * num_heads * seq * seq + bs * inter + 4 * bs
    for wm, _ in meta['head']:
        _, _, kk, nn = wm
        flops += 2 * bs * kk * nn
    bytes_acc = 4 * (bs * hidden + slab_size + bs * out_dim)
    return int(flops), int(trans), int(bytes_acc)


def bert_lower_dim_encoder_pallas(x, slab, meta, *, num_heads):
    """Fused forward: all BERT layers + MLP head in a single gridless pallas_call."""
    B, S, H = x.shape
    head_dim = H // num_heads
    out_dim = meta['head'][-1][0][3]

    flops, trans, bytes_acc = _cost_estimate(B * S, S, num_heads, head_dim, meta,
                                             int(slab.size), H, out_dim)

    # No grid: a grid is a sequential loop on one TensorCore (~0.35 us/step) for zero
    # benefit at this size; batch is folded into the sublane dim host-side (free reshape).
    y = pl.pallas_call(
        functools.partial(_fused_kernel, meta=meta, batch=B, seq=S,
                          num_heads=num_heads, head_dim=head_dim),
        out_shape=jax.ShapeDtypeStruct((B * S, out_dim), jnp.float32),
        cost_estimate=pl.CostEstimate(flops=flops, transcendentals=trans,
                                      bytes_accessed=bytes_acc),
    )(x.reshape(B * S, H), slab)
    return y.reshape(B, S, out_dim)


# ------------------------------------ parameter init ----------------------------------------- #
def init_params(key, hidden, num_layers, intermediate, mlp_hidden, mlp_out):
    n_linear = 6 * num_layers + len(mlp_hidden) + 1
    keys = iter(jax.random.split(key, 2 * n_linear))

    def linear(fi, fo):
        w = 0.1 * jax.random.normal(next(keys), (fi, fo), jnp.float32)
        b = 0.1 * jax.random.normal(next(keys), (1, fo), jnp.float32)
        return w, b

    layers = []
    for _ in range(num_layers):
        lp = {}
        lp['wq'], lp['bq'] = linear(hidden, hidden)
        lp['wk'], lp['bk'] = linear(hidden, hidden)
        lp['wv'], lp['bv'] = linear(hidden, hidden)
        lp['wo'], lp['bo'] = linear(hidden, hidden)
        lp['ln1_g'] = jnp.ones((1, hidden), jnp.float32)
        lp['ln1_b'] = jnp.zeros((1, hidden), jnp.float32)
        lp['wi'], lp['bi'] = linear(hidden, intermediate)
        lp['wo2'], lp['bo2'] = linear(intermediate, hidden)
        lp['ln2_g'] = jnp.ones((1, hidden), jnp.float32)
        lp['ln2_b'] = jnp.zeros((1, hidden), jnp.float32)
        layers.append(lp)

    head = []
    fi = hidden
    for d in mlp_hidden:
        w, b = linear(fi, d)
        head += [w, b]
        fi = d
    wl, bl = linear(fi, mlp_out)
    head += [wl, bl]
    return {'layers': layers, 'head': head}


# ----------------------------------- pure-JAX reference -------------------------------------- #
def _ref_layer(x, lp, *, num_heads, head_dim):
    # straightforward per-head formulation, independent of the kernel's fused/packed layout
    q = x @ lp['wq'] + lp['bq']
    k = x @ lp['wk'] + lp['bk']
    v = x @ lp['wv'] + lp['bv']
    parts = []
    for h in range(num_heads):
        sl = slice(h * head_dim, (h + 1) * head_dim)
        s = (q[:, sl] @ k[:, sl].T) / math.sqrt(head_dim)
        p = jax.nn.softmax(s, axis=-1)
        parts.append(p @ v[:, sl])
    ctx = jnp.concatenate(parts, axis=-1)
    attn = ctx @ lp['wo'] + lp['bo']
    h1 = _layernorm(x + attn, lp['ln1_g'], lp['ln1_b'])
    inter = _gelu(h1 @ lp['wi'] + lp['bi'])
    ffn = inter @ lp['wo2'] + lp['bo2']
    return _layernorm(h1 + ffn, lp['ln2_g'], lp['ln2_b'])


def ref_forward(x, params, *, num_heads):
    B, S, H = x.shape
    hd = H // num_heads
    hw = params['head']
    num_hidden = (len(hw) - 2) // 2

    def per_seq(xs):
        y = xs
        for lp in params['layers']:
            y = _ref_layer(y, lp, num_heads=num_heads, head_dim=hd)
        for i in range(num_hidden):
            y = y @ hw[2 * i] + hw[2 * i + 1]
            y = jnp.where(y > 0, y, LEAKY_SLOPE * y)
        return y @ hw[-2] + hw[-1]

    return jax.vmap(per_seq)(x)


# ----------------------------------------- main ---------------------------------------------- #
if __name__ == "__main__":
    # config: hidden_size=32, num_attention_heads=4, intermediate_size=64,
    #         num_hidden_layers=2, mlp_hidden_size=[64, 32], mlp_output_size=16
    B, S, H = 2, 8, 32
    NUM_HEADS, INTERMEDIATE, NUM_LAYERS = 4, 64, 2
    MLP_HIDDEN, MLP_OUT = [64, 32], 16

    root = jax.random.PRNGKey(0)
    k_in, k_par = jax.random.split(root)
    hidden_states = jax.random.normal(k_in, (B, S, H), jnp.float32)
    params = init_params(k_par, H, NUM_LAYERS, INTERMEDIATE, MLP_HIDDEN, MLP_OUT)
    slab, meta = pack_params(params)          # one lane-padded parameter slab + static offsets

    fwd = jax.jit(lambda xx, ss: bert_lower_dim_encoder_pallas(xx, ss, meta,
                                                               num_heads=NUM_HEADS))
    out = jax.block_until_ready(fwd(hidden_states, slab))
    assert out.shape == (B, S, MLP_OUT)

    # independent pure-JAX reference (exact softmax division, per-head loop, unpacked params)
    ref = jax.block_until_ready(ref_forward(hidden_states, params, num_heads=NUM_HEADS))
    # tolerance covers pl.reciprocal(approx=True) in the kernel's softmax denominator
    np.testing.assert_allclose(np.asarray(out), np.asarray(ref), rtol=2e-3, atol=2e-3)

    print("KERNEL_OK")
</pallas_src>

<mosaic_0001>
module attributes {stable_mosaic.version = 11 : i64} {
  func.func @_fused_kernel(%arg0: memref<16x32xf32, #tpu.memory_space<vmem>>, %arg1: memref<472x128xf32, #tpu.memory_space<vmem>>, %arg2: memref<16x16xf32, #tpu.memory_space<vmem>>) attributes {dimension_semantics = [], scalar_prefetch = 0 : i64, scratch_operands = 0 : i64, tpu.core_type = #tpu.core_type<tc>} {
    %c0 = arith.constant 0 : index
    %c0_0 = arith.constant 0 : index
    %0 = vector.load %arg0[%c0, %c0_0] : memref<16x32xf32, #tpu.memory_space<vmem>>, vector<16x32xf32>
    %c0_1 = arith.constant 0 : index
    %c0_2 = arith.constant 0 : index
    %1 = vector.load %arg1[%c0_1, %c0_2] : memref<472x128xf32, #tpu.memory_space<vmem>>, vector<32x96xf32>
    %cst = arith.constant dense<0.000000e+00> : vector<16x96xf32>
    %2 = tpu.matmul %0, %1, %cst {dimension_numbers = #tpu.dot_dimension_numbers<[1], [0], [0], [1], [0, 0, 1, 1], [], []>} : vector<16x32xf32>, vector<32x96xf32>, vector<16x96xf32> -> vector<16x96xf32>
    %c160 = arith.constant 160 : index
    %c0_3 = arith.constant 0 : index
    %3 = vector.load %arg1[%c160, %c0_3] : memref<472x128xf32, #tpu.memory_space<vmem>>, vector<1x96xf32>
    %4 = vector.broadcast %3 : vector<1x96xf32> to vector<16x96xf32>
    %5 = arith.addf %2, %4 : vector<16x96xf32>
    %6 = vector.extract_strided_slice %5 {offsets = [0, 0], sizes = [16, 32], strides = [1, 1]} : vector<16x96xf32> to vector<16x32xf32>
    %7 = vector.extract_strided_slice %6 {offsets = [0, 0], sizes = [8, 8], strides = [1, 1]} : vector<16x32xf32> to vector<8x8xf32>
    %8 = vector.extract_strided_slice %6 {offsets = [0, 8], sizes = [8, 8], strides = [1, 1]} : vector<16x32xf32> to vector<8x8xf32>
    %9 = vector.extract_strided_slice %6 {offsets = [0, 16], sizes = [8, 8], strides = [1, 1]} : vector<16x32xf32> to vector<8x8xf32>
    %10 = vector.extract_strided_slice %6 {offsets = [0, 24], sizes = [8, 8], strides = [1, 1]} : vector<16x32xf32> to vector<8x8xf32>
    %11 = vector.extract_strided_slice %6 {offsets = [8, 0], sizes = [8, 8], strides = [1, 1]} : vector<16x32xf32> to vector<8x8xf32>
    %12 = vector.extract_strided_slice %6 {offsets = [8, 8], sizes = [8, 8], strides = [1, 1]} : vector<16x32xf32> to vector<8x8xf32>
    %13 = vector.extract_strided_slice %6 {offsets = [8, 16], sizes = [8, 8], strides = [1, 1]} : vector<16x32xf32> to vector<8x8xf32>
    %14 = vector.extract_strided_slice %6 {offsets = [8, 24], sizes = [8, 8], strides = [1, 1]} : vector<16x32xf32> to vector<8x8xf32>
    %15 = vector.shape_cast %7 : vector<8x8xf32> to vector<1x8x8xf32>
    %16 = vector.shape_cast %8 : vector<8x8xf32> to vector<1x8x8xf32>
    %17 = vector.shape_cast %9 : vector<8x8xf32> to vector<1x8x8xf32>
    %18 = vector.shape_cast %10 : vector<8x8xf32> to vector<1x8x8xf32>
    %19 = vector.shape_cast %11 : vector<8x8xf32> to vector<1x8x8xf32>
    %20 = vector.shape_cast %12 : vector<8x8xf32> to vector<1x8x8xf32>
    %21 = vector.shape_cast %13 : vector<8x8xf32> to vector<1x8x8xf32>
    %22 = vector.shape_cast %14 : vector<8x8xf32> to vector<1x8x8xf32>
    %23 = tpu.concatenate %15, %16, %17, %18, %19, %20, %21, %22 in 0 : vector<1x8x8xf32>, vector<1x8x8xf32>, vector<1x8x8xf32>, vector<1x8x8xf32>, vector<1x8x8xf32>, vector<1x8x8xf32>, vector<1x8x8xf32>, vector<1x8x8xf32> -> vector<8x8x8xf32>
    %24 = vector.extract_strided_slice %5 {offsets = [0, 32], sizes = [16, 32], strides = [1, 1]} : vector<16x96xf32> to vector<16x32xf32>
    %25 = vector.extract_strided_slice %24 {offsets = [0, 0], sizes = [8, 8], strides = [1, 1]} : vector<16x32xf32> to vector<8x8xf32>
    %26 = vector.extract_strided_slice %24 {offsets = [0, 8], sizes = [8, 8], strides = [1, 1]} : vector<16x32xf32> to vector<8x8xf32>
    %27 = vector.extract_strided_slice %24 {offsets = [0, 16], sizes = [8, 8], strides = [1, 1]} : vector<16x32xf32> to vector<8x8xf32>
    %28 = vector.extract_strided_slice %24 {offsets = [0, 24], sizes = [8, 8], strides = [1, 1]} : vector<16x32xf32> to vector<8x8xf32>
    %29 = vector.extract_strided_slice %24 {offsets = [8, 0], sizes = [8, 8], strides = [1, 1]} : vector<16x32xf32> to vector<8x8xf32>
    %30 = vector.extract_strided_slice %24 {offsets = [8, 8], sizes = [8, 8], strides = [1, 1]} : vector<16x32xf32> to vector<8x8xf32>
    %31 = vector.extract_strided_slice %24 {offsets = [8, 16], sizes = [8, 8], strides = [1, 1]} : vector<16x32xf32> to vector<8x8xf32>
    %32 = vector.extract_strided_slice %24 {offsets = [8, 24], sizes = [8, 8], strides = [1, 1]} : vector<16x32xf32> to vector<8x8xf32>
    %33 = vector.shape_cast %25 : vector<8x8xf32> to vector<1x8x8xf32>
    %34 = vector.shape_cast %26 : vector<8x8xf32> to vector<1x8x8xf32>
    %35 = vector.shape_cast %27 : vector<8x8xf32> to vector<1x8x8xf32>
    %36 = vector.shape_cast %28 : vector<8x8xf32> to vector<1x8x8xf32>
    %37 = vector.shape_cast %29 : vector<8x8xf32> to vector<1x8x8xf32>
    %38 = vector.shape_cast %30 : vector<8x8xf32> to vector<1x8x8xf32>
    %39 = vector.shape_cast %31 : vector<8x8xf32> to vector<1x8x8xf32>
    %40 = vector.shape_cast %32 : vector<8x8xf32> to vector<1x8x8xf32>
    %41 = tpu.concatenate %33, %34, %35, %36, %37, %38, %39, %40 in 0 : vector<1x8x8xf32>, vector<1x8x8xf32>, vector<1x8x8xf32>, vector<1x8x8xf32>, vector<1x8x8xf32>, vector<1x8x8xf32>, vector<1x8x8xf32>, vector<1x8x8xf32> -> vector<8x8x8xf32>
    %42 = vector.extract_strided_slice %5 {offsets = [0, 64], sizes = [16, 32], strides = [1, 1]} : vector<16x96xf32> to vector<16x32xf32>
    %43 = vector.extract_strided_slice %42 {offsets = [0, 0], sizes = [8, 8], strides = [1, 1]} : vector<16x32xf32> to vector<8x8xf32>
    %44 = vector.extract_strided_slice %42 {offsets = [0, 8], sizes = [8, 8], strides = [1, 1]} : vector<16x32xf32> to vector<8x8xf32>
    %45 = vector.extract_strided_slice %42 {offsets = [0, 16], sizes = [8, 8], strides = [1, 1]} : vector<16x32xf32> to vector<8x8xf32>
    %46 = vector.extract_strided_slice %42 {offsets = [0, 24], sizes = [8, 8], strides = [1, 1]} : vector<16x32xf32> to vector<8x8xf32>
    %47 = vector.extract_strided_slice %42 {offsets = [8, 0], sizes = [8, 8], strides = [1, 1]} : vector<16x32xf32> to vector<8x8xf32>
    %48 = vector.extract_strided_slice %42 {offsets = [8, 8], sizes = [8, 8], strides = [1, 1]} : vector<16x32xf32> to vector<8x8xf32>
    %49 = vector.extract_strided_slice %42 {offsets = [8, 16], sizes = [8, 8], strides = [1, 1]} : vector<16x32xf32> to vector<8x8xf32>
    %50 = vector.extract_strided_slice %42 {offsets = [8, 24], sizes = [8, 8], strides = [1, 1]} : vector<16x32xf32> to vector<8x8xf32>
    %51 = vector.shape_cast %43 : vector<8x8xf32> to vector<1x8x8xf32>
    %52 = vector.shape_cast %44 : vector<8x8xf32> to vector<1x8x8xf32>
    %53 = vector.shape_cast %45 : vector<8x8xf32> to vector<1x8x8xf32>
    %54 = vector.shape_cast %46 : vector<8x8xf32> to vector<1x8x8xf32>
    %55 = vector.shape_cast %47 : vector<8x8xf32> to vector<1x8x8xf32>
    %56 = vector.shape_cast %48 : vector<8x8xf32> to vector<1x8x8xf32>
    %57 = vector.shape_cast %49 : vector<8x8xf32> to vector<1x8x8xf32>
    %58 = vector.shape_cast %50 : vector<8x8xf32> to vector<1x8x8xf32>
    %59 = tpu.concatenate %51, %52, %53, %54, %55, %56, %57, %58 in 0 : vector<1x8x8xf32>, vector<1x8x8xf32>, vector<1x8x8xf32>, vector<1x8x8xf32>, vector<1x8x8xf32>, vector<1x8x8xf32>, vector<1x8x8xf32>, vector<1x8x8xf32> -> vector<8x8x8xf32>
    %cst_4 = arith.constant dense<0.000000e+00> : vector<8x8x8xf32>
    %60 = tpu.matmul %23, %41, %cst_4 {dimension_numbers = #tpu.dot_dimension_numbers<[2], [2], [1], [1], [0, 0, 0, 1, 1, 1], [0], [0]>} : vector<8x8x8xf32>, vector<8x8x8xf32>, vector<8x8x8xf32> -> vector<8x8x8xf32>
    %cst_5 = arith.constant 0.353553385 : f32
    %61 = vector.broadcast %cst_5 : f32 to vector<8x8x8xf32>
    %62 = arith.mulf %60, %61 : vector<8x8x8xf32>
    %cst_6 = arith.constant dense<0xFF800000> : vector<8x8xf32>
    %63 = vector.multi_reduction <maximumf>, %62, %cst_6 [2] : vector<8x8x8xf32> to vector<8x8xf32>
    %64 = vector.shape_cast %63 : vector<8x8xf32> to vector<8x8x1xf32>
    %65 = vector.broadcast %64 : vector<8x8x1xf32> to vector<8x8x8xf32>
    %66 = arith.subf %62, %65 : vector<8x8x8xf32>
    %67 = math.exp %66 : vector<8x8x8xf32>
    %cst_7 = arith.constant dense<0.000000e+00> : vector<8x8xf32>
    %68 = vector.multi_reduction <add>, %67, %cst_7 [2] : vector<8x8x8xf32> to vector<8x8xf32>
    %69 = vector.shape_cast %68 : vector<8x8xf32> to vector<8x8x1xf32>
    %70 = tpu.reciprocal %69 {approx = true} : vector<8x8x1xf32> -> vector<8x8x1xf32>
    %71 = vector.broadcast %70 : vector<8x8x1xf32> to vector<8x8x8xf32>
    %72 = arith.mulf %67, %71 : vector<8x8x8xf32>
    %cst_8 = arith.constant dense<0.000000e+00> : vector<8x8x8xf32>
    %73 = tpu.matmul %72, %59, %cst_8 {dimension_numbers = #tpu.dot_dimension_numbers<[2], [1], [1], [2], [0, 0, 0, 1, 1, 2], [0], [0]>} : vector<8x8x8xf32>, vector<8x8x8xf32>, vector<8x8x8xf32> -> vector<8x8x8xf32>
    %74 = vector.extract_strided_slice %73 {offsets = [0, 0, 0], sizes = [1, 8, 8], strides = [1, 1, 1]} : vector<8x8x8xf32> to vector<1x8x8xf32>
    %75 = vector.shape_cast %74 : vector<1x8x8xf32> to vector<8x8xf32>
    %76 = vector.extract_strided_slice %73 {offsets = [1, 0, 0], sizes = [1, 8, 8], strides = [1, 1, 1]} : vector<8x8x8xf32> to vector<1x8x8xf32>
    %77 = vector.shape_cast %76 : vector<1x8x8xf32> to vector<8x8xf32>
    %78 = vector.extract_strided_slice %73 {offsets = [2, 0, 0], sizes = [1, 8, 8], strides = [1, 1, 1]} : vector<8x8x8xf32> to vector<1x8x8xf32>
    %79 = vector.shape_cast %78 : vector<1x8x8xf32> to vector<8x8xf32>
    %80 = vector.extract_strided_slice %73 {offsets = [3, 0, 0], sizes = [1, 8, 8], strides = [1, 1, 1]} : vector<8x8x8xf32> to vector<1x8x8xf32>
    %81 = vector.shape_cast %80 : vector<1x8x8xf32> to vector<8x8xf32>
    %82 = tpu.concatenate %75, %77, %79, %81 in 1 : vector<8x8xf32>, vector<8x8xf32>, vector<8x8xf32>, vector<8x8xf32> -> vector<8x32xf32>
    %83 = vector.extract_strided_slice %73 {offsets = [4, 0, 0], sizes = [1, 8, 8], strides = [1, 1, 1]} : vector<8x8x8xf32> to vector<1x8x8xf32>
    %84 = vector.shape_cast %83 : vector<1x8x8xf32> to vector<8x8xf32>
    %85 = vector.extract_strided_slice %73 {offsets = [5, 0, 0], sizes = [1, 8, 8], strides = [1, 1, 1]} : vector<8x8x8xf32> to vector<1x8x8xf32>
    %86 = vector.shape_cast %85 : vector<1x8x8xf32> to vector<8x8xf32>
    %87 = vector.extract_strided_slice %73 {offsets = [6, 0, 0], sizes = [1, 8, 8], strides = [1, 1, 1]} : vector<8x8x8xf32> to vector<1x8x8xf32>
    %88 = vector.shape_cast %87 : vector<1x8x8xf32> to vector<8x8xf32>
    %89 = vector.extract_strided_slice %73 {offsets = [7, 0, 0], sizes = [1, 8, 8], strides = [1, 1, 1]} : vector<8x8x8xf32> to vector<1x8x8xf32>
    %90 = vector.shape_cast %89 : vector<1x8x8xf32> to vector<8x8xf32>
    %91 = tpu.concatenate %84, %86, %88, %90 in 1 : vector<8x8xf32>, vector<8x8xf32>, vector<8x8xf32>, vector<8x8xf32> -> vector<8x32xf32>
    %92 = tpu.concatenate %82, %91 in 0 : vector<8x32xf32>, vector<8x32xf32> -> vector<16x32xf32>
    %c32 = arith.constant 32 : index
    %c0_9 = arith.constant 0 : index
    %93 = vector.load %arg1[%c32, %c0_9] : memref<472x128xf32, #tpu.memory_space<vmem>>, vector<32x32xf32>
    %cst_10 = arith.constant dense<0.000000e+00> : vector<16x32xf32>
    %94 = tpu.matmul %92, %93, %cst_10 {dimension_numbers = #tpu.dot_dimension_numbers<[1], [0], [0], [1], [0, 0, 1, 1], [], []>} : vector<16x32xf32>, vector<32x32xf32>, vector<16x32xf32> -> vector<16x32xf32>
    %c161 = arith.constant 161 : index
    %c0_11 = arith.constant 0 : index
    %95 = vector.load %arg1[%c161, %c0_11] : memref<472x128xf32, #tpu.memory_space<vmem>>, vector<1x32xf32>
    %96 = vector.broadcast %95 : vector<1x32xf32> to vector<16x32xf32>
    %97 = arith.addf %94, %96 : vector<16x32xf32>
    %98 = arith.addf %0, %97 : vector<16x32xf32>
    %c162 = arith.constant 162 : index
    %c0_12 = arith.constant 0 : index
    %99 = vector.load %arg1[%c162, %c0_12] : memref<472x128xf32, #tpu.memory_space<vmem>>, vector<1x32xf32>
    %c163 = arith.constant 163 : index
    %c0_13 = arith.constant 0 : index
    %100 = vector.load %arg1[%c163, %c0_13] : memref<472x128xf32, #tpu.memory_space<vmem>>, vector<1x32xf32>
    %cst_14 = arith.constant dense<0.000000e+00> : vector<16xf32>
    %101 = vector.multi_reduction <add>, %98, %cst_14 [1] : vector<16x32xf32> to vector<16xf32>
    %102 = vector.shape_cast %101 : vector<16xf32> to vector<16x1xf32>
    %cst_15 = arith.constant 3.200000e+01 : f32
    %103 = vector.broadcast %cst_15 : f32 to vector<16x1xf32>
    %104 = arith.divf %102, %103 : vector<16x1xf32>
    %105 = vector.broadcast %104 : vector<16x1xf32> to vector<16x32xf32>
    %106 = arith.subf %98, %105 : vector<16x32xf32>
    %107 = arith.mulf %106, %106 : vector<16x32xf32>
    %cst_16 = arith.constant dense<0.000000e+00> : vector<16xf32>
    %108 = vector.multi_reduction <add>, %107, %cst_16 [1] : vector<16x32xf32> to vector<16xf32>
    %109 = vector.shape_cast %108 : vector<16xf32> to vector<16x1xf32>
    %cst_17 = arith.constant 3.200000e+01 : f32
    %110 = vector.broadcast %cst_17 : f32 to vector<16x1xf32>
    %111 = arith.divf %109, %110 : vector<16x1xf32>
    %112 = vector.broadcast %104 : vector<16x1xf32> to vector<16x32xf32>
    %113 = arith.subf %98, %112 : vector<16x32xf32>
    %cst_18 = arith.constant 9.99999996E-13 : f32
    %114 = vector.broadcast %cst_18 : f32 to vector<16x1xf32>
    %115 = arith.addf %111, %114 : vector<16x1xf32>
    %116 = math.rsqrt %115 : vector<16x1xf32>
    %117 = vector.broadcast %116 : vector<16x1xf32> to vector<16x32xf32>
    %118 = arith.mulf %113, %117 : vector<16x32xf32>
    %119 = vector.broadcast %99 : vector<1x32xf32> to vector<16x32xf32>
    %120 = arith.mulf %118, %119 : vector<16x32xf32>
    %121 = vector.broadcast %100 : vector<1x32xf32> to vector<16x32xf32>
    %122 = arith.addf %120, %121 : vector<16x32xf32>
    %c64 = arith.constant 64 : index
    %c0_19 = arith.constant 0 : index
    %123 = vector.load %arg1[%c64, %c0_19] : memref<472x128xf32, #tpu.memory_space<vmem>>, vector<32x64xf32>
    %cst_20 = arith.constant dense<0.000000e+00> : vector<16x64xf32>
    %124 = tpu.matmul %122, %123, %cst_20 {dimension_numbers = #tpu.dot_dimension_numbers<[1], [0], [0], [1], [0, 0, 1, 1], [], []>} : vector<16x32xf32>, vector<32x64xf32>, vector<16x64xf32> -> vector<16x64xf32>
    %c164 = arith.constant 164 : index
    %c0_21 = arith.constant 0 : index
    %125 = vector.load %arg1[%c164, %c0_21] : memref<472x128xf32, #tpu.memory_space<vmem>>, vector<1x64xf32>
    %126 = vector.broadcast %125 : vector<1x64xf32> to vector<16x64xf32>
    %127 = arith.addf %124, %126 : vector<16x64xf32>
    %cst_22 = arith.constant 5.000000e-01 : f32
    %128 = vector.broadcast %cst_22 : f32 to vector<16x64xf32>
    %129 = arith.mulf %128, %127 : vector<16x64xf32>
    %cst_23 = arith.constant 4.471500e-02 : f32
    %130 = vector.broadcast %cst_23 : f32 to vector<16x64xf32>
    %131 = arith.mulf %130, %127 : vector<16x64xf32>
    %132 = arith.mulf %131, %127 : vector<16x64xf32>
    %133 = arith.mulf %132, %127 : vector<16x64xf32>
    %134 = arith.addf %127, %133 : vector<16x64xf32>
    %cst_24 = arith.constant 0.797884583 : f32
    %135 = vector.broadcast %cst_24 : f32 to vector<16x64xf32>
    %136 = arith.mulf %135, %134 : vector<16x64xf32>
    %137 = math.tanh %136 : vector<16x64xf32>
    %cst_25 = arith.constant 1.000000e+00 : f32
    %138 = vector.broadcast %cst_25 : f32 to vector<16x64xf32>
    %139 = arith.addf %138, %137 : vector<16x64xf32>
    %140 = arith.mulf %129, %139 : vector<16x64xf32>
    %c96 = arith.constant 96 : index
    %c0_26 = arith.constant 0 : index
    %141 = vector.load %arg1[%c96, %c0_26] : memref<472x128xf32, #tpu.memory_space<vmem>>, vector<64x32xf32>
    %cst_27 = arith.constant dense<0.000000e+00> : vector<16x32xf32>
    %142 = tpu.matmul %140, %141, %cst_27 {dimension_numbers = #tpu.dot_dimension_numbers<[1], [0], [0], [1], [0, 0, 1, 1], [], []>} : vector<16x64xf32>, vector<64x32xf32>, vector<16x32xf32> -> vector<16x32xf32>
    %c165 = arith.constant 165 : index
    %c0_28 = arith.constant 0 : index
    %143 = vector.load %arg1[%c165, %c0_28] : memref<472x128xf32, #tpu.memory_space<vmem>>, vector<1x32xf32>
    %144 = vector.broadcast %143 : vector<1x32xf32> to vector<16x32xf32>
    %145 = arith.addf %142, %144 : vector<16x32xf32>
    %146 = arith.addf %122, %145 : vector<16x32xf32>
    %c166 = arith.constant 166 : index
    %c0_29 = arith.constant 0 : index
    %147 = vector.load %arg1[%c166, %c0_29] : memref<472x128xf32, #tpu.memory_space<vmem>>, vector<1x32xf32>
    %c167 = arith.constant 167 : index
    %c0_30 = arith.constant 0 : index
    %148 = vector.load %arg1[%c167, %c0_30] : memref<472x128xf32, #tpu.memory_space<vmem>>, vector<1x32xf32>
    %cst_31 = arith.constant dense<0.000000e+00> : vector<16xf32>
    %149 = vector.multi_reduction <add>, %146, %cst_31 [1] : vector<16x32xf32> to vector<16xf32>
    %150 = vector.shape_cast %149 : vector<16xf32> to vector<16x1xf32>
    %cst_32 = arith.constant 3.200000e+01 : f32
    %151 = vector.broadcast %cst_32 : f32 to vector<16x1xf32>
    %152 = arith.divf %150, %151 : vector<16x1xf32>
    %153 = vector.broadcast %152 : vector<16x1xf32> to vector<16x32xf32>
    %154 = arith.subf %146, %153 : vector<16x32xf32>
    %155 = arith.mulf %154, %154 : vector<16x32xf32>
    %cst_33 = arith.constant dense<0.000000e+00> : vector<16xf32>
    %156 = vector.multi_reduction <add>, %155, %cst_33 [1] : vector<16x32xf32> to vector<16xf32>
    %157 = vector.shape_cast %156 : vector<16xf32> to vector<16x1xf32>
    %cst_34 = arith.constant 3.200000e+01 : f32
    %158 = vector.broadcast %cst_34 : f32 to vector<16x1xf32>
    %159 = arith.divf %157, %158 : vector<16x1xf32>
    %160 = vector.broadcast %152 : vector<16x1xf32> to vector<16x32xf32>
    %161 = arith.subf %146, %160 : vector<16x32xf32>
    %cst_35 = arith.constant 9.99999996E-13 : f32
    %162 = vector.broadcast %cst_35 : f32 to vector<16x1xf32>
    %163 = arith.addf %159, %162 : vector<16x1xf32>
    %164 = math.rsqrt %163 : vector<16x1xf32>
    %165 = vector.broadcast %164 : vector<16x1xf32> to vector<16x32xf32>
    %166 = arith.mulf %161, %165 : vector<16x32xf32>
    %167 = vector.broadcast %147 : vector<1x32xf32> to vector<16x32xf32>
    %168 = arith.mulf %166, %167 : vector<16x32xf32>
    %169 = vector.broadcast %148 : vector<1x32xf32> to vector<16x32xf32>
    %170 = arith.addf %168, %169 : vector<16x32xf32>
    %c168 = arith.constant 168 : index
    %c0_36 = arith.constant 0 : index
    %171 = vector.load %arg1[%c168, %c0_36] : memref<472x128xf32, #tpu.memory_space<vmem>>, vector<32x96xf32>
    %cst_37 = arith.constant dense<0.000000e+00> : vector<16x96xf32>
    %172 = tpu.matmul %170, %171, %cst_37 {dimension_numbers = #tpu.dot_dimension_numbers<[1], [0], [0], [1], [0, 0, 1, 1], [], []>} : vector<16x32xf32>, vector<32x96xf32>, vector<16x96xf32> -> vector<16x96xf32>
    %c328 = arith.constant 328 : index
    %c0_38 = arith.constant 0 : index
    %173 = vector.load %arg1[%c328, %c0_38] : memref<472x128xf32, #tpu.memory_space<vmem>>, vector<1x96xf32>
    %174 = vector.broadcast %173 : vector<1x96xf32> to vector<16x96xf32>
    %175 = arith.addf %172, %174 : vector<16x96xf32>
    %176 = vector.extract_strided_slice %175 {offsets = [0, 0], sizes = [16, 32], strides = [1, 1]} : vector<16x96xf32> to vector<16x32xf32>
    %177 = vector.extract_strided_slice %176 {offsets = [0, 0], sizes = [8, 8], strides = [1, 1]} : vector<16x32xf32> to vector<8x8xf32>
    %178 = vector.extract_strided_slice %176 {offsets = [0, 8], sizes = [8, 8], strides = [1, 1]} : vector<16x32xf32> to vector<8x8xf32>
    %179 = vector.extract_strided_slice %176 {offsets = [0, 16], sizes = [8, 8], strides = [1, 1]} : vector<16x32xf32> to vector<8x8xf32>
    %180 = vector.extract_strided_slice %176 {offsets = [0, 24], sizes = [8, 8], strides = [1, 1]} : vector<16x32xf32> to vector<8x8xf32>
    %181 = vector.extract_strided_slice %176 {offsets = [8, 0], sizes = [8, 8], strides = [1, 1]} : vector<16x32xf32> to vector<8x8xf32>
    %182 = vector.extract_strided_slice %176 {offsets = [8, 8], sizes = [8, 8], strides = [1, 1]} : vector<16x32xf32> to vector<8x8xf32>
    %183 = vector.extract_strided_slice %176 {offsets = [8, 16], sizes = [8, 8], strides = [1, 1]} : vector<16x32xf32> to vector<8x8xf32>
    %184 = vector.extract_strided_slice %176 {offsets = [8, 24], sizes = [8, 8], strides = [1, 1]} : vector<16x32xf32> to vector<8x8xf32>
    %185 = vector.shape_cast %177 : vector<8x8xf32> to vector<1x8x8xf32>
    %186 = vector.shape_cast %178 : vector<8x8xf32> to vector<1x8x8xf32>
    %187 = vector.shape_cast %179 : vector<8x8xf32> to vector<1x8x8xf32>
    %188 = vector.shape_cast %180 : vector<8x8xf32> to vector<1x8x8xf32>
    %189 = vector.shape_cast %181 : vector<8x8xf32> to vector<1x8x8xf32>
    %190 = vector.shape_cast %182 : vector<8x8xf32> to vector<1x8x8xf32>
    %191 = vector.shape_cast %183 : vector<8x8xf32> to vector<1x8x8xf32>
    %192 = vector.shape_cast %184 : vector<8x8xf32> to vector<1x8x8xf32>
    %193 = tpu.concatenate %185, %186, %187, %188, %189, %190, %191, %192 in 0 : vector<1x8x8xf32>, vector<1x8x8xf32>, vector<1x8x8xf32>, vector<1x8x8xf32>, vector<1x8x8xf32>, vector<1x8x8xf32>, vector<1x8x8xf32>, vector<1x8x8xf32> -> vector<8x8x8xf32>
    %194 = vector.extract_strided_slice %175 {offsets = [0, 32], sizes = [16, 32], strides = [1, 1]} : vector<16x96xf32> to vector<16x32xf32>
    %195 = vector.extract_strided_slice %194 {offsets = [0, 0], sizes = [8, 8], strides = [1, 1]} : vector<16x32xf32> to vector<8x8xf32>
    %196 = vector.extract_strided_slice %194 {offsets = [0, 8], sizes = [8, 8], strides = [1, 1]} : vector<16x32xf32> to vector<8x8xf32>
    %197 = vector.extract_strided_slice %194 {offsets = [0, 16], sizes = [8, 8], strides = [1, 1]} : vector<16x32xf32> to vector<8x8xf32>
    %198 = vector.extract_strided_slice %194 {offsets = [0, 24], sizes = [8, 8], strides = [1, 1]} : vector<16x32xf32> to vector<8x8xf32>
    %199 = vector.extract_strided_slice %194 {offsets = [8, 0], sizes = [8, 8], strides = [1, 1]} : vector<16x32xf32> to vector<8x8xf32>
    %200 = vector.extract_strided_slice %194 {offsets = [8, 8], sizes = [8, 8], strides = [1, 1]} : vector<16x32xf32> to vector<8x8xf32>
    %201 = vector.extract_strided_slice %194 {offsets = [8, 16], sizes = [8, 8], strides = [1, 1]} : vector<16x32xf32> to vector<8x8xf32>
    %202 = vector.extract_strided_slice %194 {offsets = [8, 24], sizes = [8, 8], strides = [1, 1]} : vector<16x32xf32> to vector<8x8xf32>
    %203 = vector.shape_cast %195 : vector<8x8xf32> to vector<1x8x8xf32>
    %204 = vector.shape_cast %196 : vector<8x8xf32> to vector<1x8x8xf32>
    %205 = vector.shape_cast %197 : vector<8x8xf32> to vector<1x8x8xf32>
    %206 = vector.shape_cast %198 : vector<8x8xf32> to vector<1x8x8xf32>
    %207 = vector.shape_cast %199 : vector<8x8xf32> to vector<1x8x8xf32>
    %208 = vector.shape_cast %200 : vector<8x8xf32> to vector<1x8x8xf32>
    %209 = vector.shape_cast %201 : vector<8x8xf32> to vector<1x8x8xf32>
    %210 = vector.shape_cast %202 : vector<8x8xf32> to vector<1x8x8xf32>
    %211 = tpu.concatenate %203, %204, %205, %206, %207, %208, %209, %210 in 0 : vector<1x8x8xf32>, vector<1x8x8xf32>, vector<1x8x8xf32>, vector<1x8x8xf32>, vector<1x8x8xf32>, vector<1x8x8xf32>, vector<1x8x8xf32>, vector<1x8x8xf32> -> vector<8x8x8xf32>
    %212 = vector.extract_strided_slice %175 {offsets = [0, 64], sizes = [16, 32], strides = [1, 1]} : vector<16x96xf32> to vector<16x32xf32>
    %213 = vector.extract_strided_slice %212 {offsets = [0, 0], sizes = [8, 8], strides = [1, 1]} : vector<16x32xf32> to vector<8x8xf32>
    %214 = vector.extract_strided_slice %212 {offsets = [0, 8], sizes = [8, 8], strides = [1, 1]} : vector<16x32xf32> to vector<8x8xf32>
    %215 = vector.extract_strided_slice %212 {offsets = [0, 16], sizes = [8, 8], strides = [1, 1]} : vector<16x32xf32> to vector<8x8xf32>
    %216 = vector.extract_strided_slice %212 {offsets = [0, 24], sizes = [8, 8], strides = [1, 1]} : vector<16x32xf32> to vector<8x8xf32>
    %217 = vector.extract_strided_slice %212 {offsets = [8, 0], sizes = [8, 8], strides = [1, 1]} : vector<16x32xf32> to vector<8x8xf32>
    %218 = vector.extract_strided_slice %212 {offsets = [8, 8], sizes = [8, 8], strides = [1, 1]} : vector<16x32xf32> to vector<8x8xf32>
    %219 = vector.extract_strided_slice %212 {offsets = [8, 16], sizes = [8, 8], strides = [1, 1]} : vector<16x32xf32> to vector<8x8xf32>
    %220 = vector.extract_strided_slice %212 {offsets = [8, 24], sizes = [8, 8], strides = [1, 1]} : vector<16x32xf32> to vector<8x8xf32>
    %221 = vector.shape_cast %213 : vector<8x8xf32> to vector<1x8x8xf32>
    %222 = vector.shape_cast %214 : vector<8x8xf32> to vector<1x8x8xf32>
    %223 = vector.shape_cast %215 : vector<8x8xf32> to vector<1x8x8xf32>
    %224 = vector.shape_cast %216 : vector<8x8xf32> to vector<1x8x8xf32>
    %225 = vector.shape_cast %217 : vector<8x8xf32> to vector<1x8x8xf32>
    %226 = vector.shape_cast %218 : vector<8x8xf32> to vector<1x8x8xf32>
    %227 = vector.shape_cast %219 : vector<8x8xf32> to vector<1x8x8xf32>
    %228 = vector.shape_cast %220 : vector<8x8xf32> to vector<1x8x8xf32>
    %229 = tpu.concatenate %221, %222, %223, %224, %225, %226, %227, %228 in 0 : vector<1x8x8xf32>, vector<1x8x8xf32>, vector<1x8x8xf32>, vector<1x8x8xf32>, vector<1x8x8xf32>, vector<1x8x8xf32>, vector<1x8x8xf32>, vector<1x8x8xf32> -> vector<8x8x8xf32>
    %cst_39 = arith.constant dense<0.000000e+00> : vector<8x8x8xf32>
    %230 = tpu.matmul %193, %211, %cst_39 {dimension_numbers = #tpu.dot_dimension_numbers<[2], [2], [1], [1], [0, 0, 0, 1, 1, 1], [0], [0]>} : vector<8x8x8xf32>, vector<8x8x8xf32>, vector<8x8x8xf32> -> vector<8x8x8xf32>
    %cst_40 = arith.constant 0.353553385 : f32
    %231 = vector.broadcast %cst_40 : f32 to vector<8x8x8xf32>
    %232 = arith.mulf %230, %231 : vector<8x8x8xf32>
    %cst_41 = arith.constant dense<0xFF800000> : vector<8x8xf32>
    %233 = vector.multi_reduction <maximumf>, %232, %cst_41 [2] : vector<8x8x8xf32> to vector<8x8xf32>
    %234 = vector.shape_cast %233 : vector<8x8xf32> to vector<8x8x1xf32>
    %235 = vector.broadcast %234 : vector<8x8x1xf32> to vector<8x8x8xf32>
    %236 = arith.subf %232, %235 : vector<8x8x8xf32>
    %237 = math.exp %236 : vector<8x8x8xf32>
    %cst_42 = arith.constant dense<0.000000e+00> : vector<8x8xf32>
    %238 = vector.multi_reduction <add>, %237, %cst_42 [2] : vector<8x8x8xf32> to vector<8x8xf32>
    %239 = vector.shape_cast %238 : vector<8x8xf32> to vector<8x8x1xf32>
    %240 = tpu.reciprocal %239 {approx = true} : vector<8x8x1xf32> -> vector<8x8x1xf32>
    %241 = vector.broadcast %240 : vector<8x8x1xf32> to vector<8x8x8xf32>
    %242 = arith.mulf %237, %241 : vector<8x8x8xf32>
    %cst_43 = arith.constant dense<0.000000e+00> : vector<8x8x8xf32>
    %243 = tpu.matmul %242, %229, %cst_43 {dimension_numbers = #tpu.dot_dimension_numbers<[2], [1], [1], [2], [0, 0, 0, 1, 1, 2], [0], [0]>} : vector<8x8x8xf32>, vector<8x8x8xf32>, vector<8x8x8xf32> -> vector<8x8x8xf32>
    %244 = vector.extract_strided_slice %243 {offsets = [0, 0, 0], sizes = [1, 8, 8], strides = [1, 1, 1]} : vector<8x8x8xf32> to vector<1x8x8xf32>
    %245 = vector.shape_cast %244 : vector<1x8x8xf32> to vector<8x8xf32>
    %246 = vector.extract_strided_slice %243 {offsets = [1, 0, 0], sizes = [1, 8, 8], strides = [1, 1, 1]} : vector<8x8x8xf32> to vector<1x8x8xf32>
    %247 = vector.shape_cast %246 : vector<1x8x8xf32> to vector<8x8xf32>
    %248 = vector.extract_strided_slice %243 {offsets = [2, 0, 0], sizes = [1, 8, 8], strides = [1, 1, 1]} : vector<8x8x8xf32> to vector<1x8x8xf32>
    %249 = vector.shape_cast %248 : vector<1x8x8xf32> to vector<8x8xf32>
    %250 = vector.extract_strided_slice %243 {offsets = [3, 0, 0], sizes = [1, 8, 8], strides = [1, 1, 1]} : vector<8x8x8xf32> to vector<1x8x8xf32>
    %251 = vector.shape_cast %250 : vector<1x8x8xf32> to vector<8x8xf32>
    %252 = tpu.concatenate %245, %247, %249, %251 in 1 : vector<8x8xf32>, vector<8x8xf32>, vector<8x8xf32>, vector<8x8xf32> -> vector<8x32xf32>
    %253 = vector.extract_strided_slice %243 {offsets = [4, 0, 0], sizes = [1, 8, 8], strides = [1, 1, 1]} : vector<8x8x8xf32> to vector<1x8x8xf32>
    %254 = vector.shape_cast %253 : vector<1x8x8xf32> to vector<8x8xf32>
    %255 = vector.extract_strided_slice %243 {offsets = [5, 0, 0], sizes = [1, 8, 8], strides = [1, 1, 1]} : vector<8x8x8xf32> to vector<1x8x8xf32>
    %256 = vector.shape_cast %255 : vector<1x8x8xf32> to vector<8x8xf32>
    %257 = vector.extract_strided_slice %243 {offsets = [6, 0, 0], sizes = [1, 8, 8], strides = [1, 1, 1]} : vector<8x8x8xf32> to vector<1x8x8xf32>
    %258 = vector.shape_cast %257 : vector<1x8x8xf32> to vector<8x8xf32>
    %259 = vector.extract_strided_slice %243 {offsets = [7, 0, 0], sizes = [1, 8, 8], strides = [1, 1, 1]} : vector<8x8x8xf32> to vector<1x8x8xf32>
    %260 = vector.shape_cast %259 : vector<1x8x8xf32> to vector<8x8xf32>
    %261 = tpu.concatenate %254, %256, %258, %260 in 1 : vector<8x8xf32>, vector<8x8xf32>, vector<8x8xf32>, vector<8x8xf32> -> vector<8x32xf32>
    %262 = tpu.concatenate %252, %261 in 0 : vector<8x32xf32>, vector<8x32xf32> -> vector<16x32xf32>
    %c200 = arith.constant 200 : index
    %c0_44 = arith.constant 0 : index
    %263 = vector.load %arg1[%c200, %c0_44] : memref<472x128xf32, #tpu.memory_space<vmem>>, vector<32x32xf32>
    %cst_45 = arith.constant dense<0.000000e+00> : vector<16x32xf32>
    %264 = tpu.matmul %262, %263, %cst_45 {dimension_numbers = #tpu.dot_dimension_numbers<[1], [0], [0], [1], [0, 0, 1, 1], [], []>} : vector<16x32xf32>, vector<32x32xf32>, vector<16x32xf32> -> vector<16x32xf32>
    %c329 = arith.constant 329 : index
    %c0_46 = arith.constant 0 : index
    %265 = vector.load %arg1[%c329, %c0_46] : memref<472x128xf32, #tpu.memory_space<vmem>>, vector<1x32xf32>
    %266 = vector.broadcast %265 : vector<1x32xf32> to vector<16x32xf32>
    %267 = arith.addf %264, %266 : vector<16x32xf32>
    %268 = arith.addf %170, %267 : vector<16x32xf32>
    %c330 = arith.constant 330 : index
    %c0_47 = arith.constant 0 : index
    %269 = vector.load %arg1[%c330, %c0_47] : memref<472x128xf32, #tpu.memory_space<vmem>>, vector<1x32xf32>
    %c331 = arith.constant 331 : index
    %c0_48 = arith.constant 0 : index
    %270 = vector.load %arg1[%c331, %c0_48] : memref<472x128xf32, #tpu.memory_space<vmem>>, vector<1x32xf32>
    %cst_49 = arith.constant dense<0.000000e+00> : vector<16xf32>
    %271 = vector.multi_reduction <add>, %268, %cst_49 [1] : vector<16x32xf32> to vector<16xf32>
    %272 = vector.shape_cast %271 : vector<16xf32> to vector<16x1xf32>
    %cst_50 = arith.constant 3.200000e+01 : f32
    %273 = vector.broadcast %cst_50 : f32 to vector<16x1xf32>
    %274 = arith.divf %272, %273 : vector<16x1xf32>
    %275 = vector.broadcast %274 : vector<16x1xf32> to vector<16x32xf32>
    %276 = arith.subf %268, %275 : vector<16x32xf32>
    %277 = arith.mulf %276, %276 : vector<16x32xf32>
    %cst_51 = arith.constant dense<0.000000e+00> : vector<16xf32>
    %278 = vector.multi_reduction <add>, %277, %cst_51 [1] : vector<16x32xf32> to vector<16xf32>
    %279 = vector.shape_cast %278 : vector<16xf32> to vector<16x1xf32>
    %cst_52 = arith.constant 3.200000e+01 : f32
    %280 = vector.broadcast %cst_52 : f32 to vector<16x1xf32>
    %281 = arith.divf %279, %280 : vector<16x1xf32>
    %282 = vector.broadcast %274 : vector<16x1xf32> to vector<16x32xf32>
    %283 = arith.subf %268, %282 : vector<16x32xf32>
    %cst_53 = arith.constant 9.99999996E-13 : f32
    %284 = vector.broadcast %cst_53 : f32 to vector<16x1xf32>
    %285 = arith.addf %281, %284 : vector<16x1xf32>
    %286 = math.rsqrt %285 : vector<16x1xf32>
    %287 = vector.broadcast %286 : vector<16x1xf32> to vector<16x32xf32>
    %288 = arith.mulf %283, %287 : vector<16x32xf32>
    %289 = vector.broadcast %269 : vector<1x32xf32> to vector<16x32xf32>
    %290 = arith.mulf %288, %289 : vector<16x32xf32>
    %291 = vector.broadcast %270 : vector<1x32xf32> to vector<16x32xf32>
    %292 = arith.addf %290, %291 : vector<16x32xf32>
    %c232 = arith.constant 232 : index
    %c0_54 = arith.constant 0 : index
    %293 = vector.load %arg1[%c232, %c0_54] : memref<472x128xf32, #tpu.memory_space<vmem>>, vector<32x64xf32>
    %cst_55 = arith.constant dense<0.000000e+00> : vector<16x64xf32>
    %294 = tpu.matmul %292, %293, %cst_55 {dimension_numbers = #tpu.dot_dimension_numbers<[1], [0], [0], [1], [0, 0, 1, 1], [], []>} : vector<16x32xf32>, vector<32x64xf32>, vector<16x64xf32> -> vector<16x64xf32>
    %c332 = arith.constant 332 : index
    %c0_56 = arith.constant 0 : index
    %295 = vector.load %arg1[%c332, %c0_56] : memref<472x128xf32, #tpu.memory_space<vmem>>, vector<1x64xf32>
    %296 = vector.broadcast %295 : vector<1x64xf32> to vector<16x64xf32>
    %297 = arith.addf %294, %296 : vector<16x64xf32>
    %cst_57 = arith.constant 5.000000e-01 : f32
    %298 = vector.broadcast %cst_57 : f32 to vector<16x64xf32>
    %299 = arith.mulf %298, %297 : vector<16x64xf32>
    %cst_58 = arith.constant 4.471500e-02 : f32
    %300 = vector.broadcast %cst_58 : f32 to vector<16x64xf32>
    %301 = arith.mulf %300, %297 : vector<16x64xf32>
    %302 = arith.mulf %301, %297 : vector<16x64xf32>
    %303 = arith.mulf %302, %297 : vector<16x64xf32>
    %304 = arith.addf %297, %303 : vector<16x64xf32>
    %cst_59 = arith.constant 0.797884583 : f32
    %305 = vector.broadcast %cst_59 : f32 to vector<16x64xf32>
    %306 = arith.mulf %305, %304 : vector<16x64xf32>
    %307 = math.tanh %306 : vector<16x64xf32>
    %cst_60 = arith.constant 1.000000e+00 : f32
    %308 = vector.broadcast %cst_60 : f32 to vector<16x64xf32>
    %309 = arith.addf %308, %307 : vector<16x64xf32>
    %310 = arith.mulf %299, %309 : vector<16x64xf32>
    %c264 = arith.constant 264 : index
    %c0_61 = arith.constant 0 : index
    %311 = vector.load %arg1[%c264, %c0_61] : memref<472x128xf32, #tpu.memory_space<vmem>>, vector<64x32xf32>
    %cst_62 = arith.constant dense<0.000000e+00> : vector<16x32xf32>
    %312 = tpu.matmul %310, %311, %cst_62 {dimension_numbers = #tpu.dot_dimension_numbers<[1], [0], [0], [1], [0, 0, 1, 1], [], []>} : vector<16x64xf32>, vector<64x32xf32>, vector<16x32xf32> -> vector<16x32xf32>
    %c333 = arith.constant 333 : index
    %c0_63 = arith.constant 0 : index
    %313 = vector.load %arg1[%c333, %c0_63] : memref<472x128xf32, #tpu.memory_space<vmem>>, vector<1x32xf32>
    %314 = vector.broadcast %313 : vector<1x32xf32> to vector<16x32xf32>
    %315 = arith.addf %312, %314 : vector<16x32xf32>
    %316 = arith.addf %292, %315 : vector<16x32xf32>
    %c334 = arith.constant 334 : index
    %c0_64 = arith.constant 0 : index
    %317 = vector.load %arg1[%c334, %c0_64] : memref<472x128xf32, #tpu.memory_space<vmem>>, vector<1x32xf32>
    %c335 = arith.constant 335 : index
    %c0_65 = arith.constant 0 : index
    %318 = vector.load %arg1[%c335, %c0_65] : memref<472x128xf32, #tpu.memory_space<vmem>>, vector<1x32xf32>
    %cst_66 = arith.constant dense<0.000000e+00> : vector<16xf32>
    %319 = vector.multi_reduction <add>, %316, %cst_66 [1] : vector<16x32xf32> to vector<16xf32>
    %320 = vector.shape_cast %319 : vector<16xf32> to vector<16x1xf32>
    %cst_67 = arith.constant 3.200000e+01 : f32
    %321 = vector.broadcast %cst_67 : f32 to vector<16x1xf32>
    %322 = arith.divf %320, %321 : vector<16x1xf32>
    %323 = vector.broadcast %322 : vector<16x1xf32> to vector<16x32xf32>
    %324 = arith.subf %316, %323 : vector<16x32xf32>
    %325 = arith.mulf %324, %324 : vector<16x32xf32>
    %cst_68 = arith.constant dense<0.000000e+00> : vector<16xf32>
    %326 = vector.multi_reduction <add>, %325, %cst_68 [1] : vector<16x32xf32> to vector<16xf32>
    %327 = vector.shape_cast %326 : vector<16xf32> to vector<16x1xf32>
    %cst_69 = arith.constant 3.200000e+01 : f32
    %328 = vector.broadcast %cst_69 : f32 to vector<16x1xf32>
    %329 = arith.divf %327, %328 : vector<16x1xf32>
    %330 = vector.broadcast %322 : vector<16x1xf32> to vector<16x32xf32>
    %331 = arith.subf %316, %330 : vector<16x32xf32>
    %cst_70 = arith.constant 9.99999996E-13 : f32
    %332 = vector.broadcast %cst_70 : f32 to vector<16x1xf32>
    %333 = arith.addf %329, %332 : vector<16x1xf32>
    %334 = math.rsqrt %333 : vector<16x1xf32>
    %335 = vector.broadcast %334 : vector<16x1xf32> to vector<16x32xf32>
    %336 = arith.mulf %331, %335 : vector<16x32xf32>
    %337 = vector.broadcast %317 : vector<1x32xf32> to vector<16x32xf32>
    %338 = arith.mulf %336, %337 : vector<16x32xf32>
    %339 = vector.broadcast %318 : vector<1x32xf32> to vector<16x32xf32>
    %340 = arith.addf %338, %339 : vector<16x32xf32>
    %c336 = arith.constant 336 : index
    %c0_71 = arith.constant 0 : index
    %341 = vector.load %arg1[%c336, %c0_71] : memref<472x128xf32, #tpu.memory_space<vmem>>, vector<32x64xf32>
    %cst_72 = arith.constant dense<0.000000e+00> : vector<16x64xf32>
    %342 = tpu.matmul %340, %341, %cst_72 {dimension_numbers = #tpu.dot_dimension_numbers<[1], [0], [0], [1], [0, 0, 1, 1], [], []>} : vector<16x32xf32>, vector<32x64xf32>, vector<16x64xf32> -> vector<16x64xf32>
    %c464 = arith.constant 464 : index
    %c0_73 = arith.constant 0 : index
    %343 = vector.load %arg1[%c464, %c0_73] : memref<472x128xf32, #tpu.memory_space<vmem>>, vector<1x64xf32>
    %344 = vector.broadcast %343 : vector<1x64xf32> to vector<16x64xf32>
    %345 = arith.addf %342, %344 : vector<16x64xf32>
    %cst_74 = arith.constant 0.000000e+00 : f32
    %346 = vector.broadcast %cst_74 : f32 to vector<16x64xf32>
    %347 = arith.cmpf ogt, %345, %346 : vector<16x64xf32>
    %cst_75 = arith.constant 0.00999999977 : f32
    %348 = vector.broadcast %cst_75 : f32 to vector<16x64xf32>
    %349 = arith.mulf %348, %345 : vector<16x64xf32>
    %350 = arith.select %347, %345, %349 : vector<16x64xi1>, vector<16x64xf32>
    %c368 = arith.constant 368 : index
    %c0_76 = arith.constant 0 : index
    %351 = vector.load %arg1[%c368, %c0_76] : memref<472x128xf32, #tpu.memory_space<vmem>>, vector<64x32xf32>
    %cst_77 = arith.constant dense<0.000000e+00> : vector<16x32xf32>
    %352 = tpu.matmul %350, %351, %cst_77 {dimension_numbers = #tpu.dot_dimension_numbers<[1], [0], [0], [1], [0, 0, 1, 1], [], []>} : vector<16x64xf32>, vector<64x32xf32>, vector<16x32xf32> -> vector<16x32xf32>
    %c465 = arith.constant 465 : index
    %c0_78 = arith.constant 0 : index
    %353 = vector.load %arg1[%c465, %c0_78] : memref<472x128xf32, #tpu.memory_space<vmem>>, vector<1x32xf32>
    %354 = vector.broadcast %353 : vector<1x32xf32> to vector<16x32xf32>
    %355 = arith.addf %352, %354 : vector<16x32xf32>
    %cst_79 = arith.constant 0.000000e+00 : f32
    %356 = vector.broadcast %cst_79 : f32 to vector<16x32xf32>
    %357 = arith.cmpf ogt, %355, %356 : vector<16x32xf32>
    %cst_80 = arith.constant 0.00999999977 : f32
    %358 = vector.broadcast %cst_80 : f32 to vector<16x32xf32>
    %359 = arith.mulf %358, %355 : vector<16x32xf32>
    %360 = arith.select %357, %355, %359 : vector<16x32xi1>, vector<16x32xf32>
    %c432 = arith.constant 432 : index
    %c0_81 = arith.constant 0 : index
    %361 = vector.load %arg1[%c432, %c0_81] : memref<472x128xf32, #tpu.memory_space<vmem>>, vector<32x16xf32>
    %cst_82 = arith.constant dense<0.000000e+00> : vector<16x16xf32>
    %362 = tpu.matmul %360, %361, %cst_82 {dimension_numbers = #tpu.dot_dimension_numbers<[1], [0], [0], [1], [0, 0, 1, 1], [], []>} : vector<16x32xf32>, vector<32x16xf32>, vector<16x16xf32> -> vector<16x16xf32>
    %c466 = arith.constant 466 : index
    %c0_83 = arith.constant 0 : index
    %363 = vector.load %arg1[%c466, %c0_83] : memref<472x128xf32, #tpu.memory_space<vmem>>, vector<1x16xf32>
    %364 = vector.broadcast %363 : vector<1x16xf32> to vector<16x16xf32>
    %365 = arith.addf %362, %364 : vector<16x16xf32>
    %c0_84 = arith.constant 0 : index
    %c0_85 = arith.constant 0 : index
    %366 = vector.load %arg2[%c0_84, %c0_85] : memref<16x16xf32, #tpu.memory_space<vmem>>, vector<16x16xf32>
    tpu.vector_store %arg2[%c0_84, %c0_85], %365 {strides = array<i32>} : memref<16x16xf32, #tpu.memory_space<vmem>>, vector<16x16xf32>,
    return
  }
}

</mosaic_0001>

<bundles_post_ra>
// kernel: _lambda_.1
= control target key start
LH: loop header
LB: loop body
LE: loop exit
PB: predicated region body
PF: predicated region fallthrough
CT: control target
= control target key end

     0   :  { %7 = vsyncpa [#allocation3], 0  ;;  %s5302_s0 = inlined_call_operand.hbm [shape: f32[16,32], index: 0, kind: input, shape index: {}]   ;;  %s5303_s1 = inlined_call_operand.hbm [shape: f32[472,128], index: 1, kind: input, shape index: {}]   ;;  %s5304_s2 = inlined_call_operand.hbm [shape: f32[16,16], index: 2, kind: output, shape index: {}]  }
   0x1   :  { %8 = vsyncpa [#allocation6], 0 }
   0x2   :  { %9 = vsyncpa [#allocation4], 0  ;;  %s4820_s9 = smov [#allocation2]   ;;  %s4748_s13 = scalar_lea.hbm %s5302_s0, 256 }
   0x3   :  { %s15_s10 = sshll.u32 %s4820_s9, 4  ;;  %p4749_p0 = scmp.ne.s32.totalorder %s5302_s0, %s4748_s13  ;;  %s16_s10 = int_to_ptr.vmem [resolvable:$true] %s15_s10 }
   0x4   :  { %p4752_p1 = scmp.lt.u32.totalorder %s4748_s13, %s5302_s0 }
   0x6   :  { %p4754_p2 = pnand %p4752_p1, %p4749_p0 }
   0x8   :  { %4757 = shalt.err (!%p4754_p2)
}
   0x9   :  { %s4758_s18 = scalar_lea.vmem %s16_s10, 256  ;;  %p4763_p4 = scmp.lt.s32.totalorder %s16_s10, %s16_s10 }
   0xa   :  { %p4759_p3 = scmp.ne.s32.totalorder %s16_s10, %s4758_s18  ;;  %p4764_p5 = scmp.lt.s32.totalorder %s4758_s18, %s4758_s18 }
   0xc   :  { %p4765_p6 = por %p4764_p5, %p4763_p4 }
   0xe   :  { %p4766_p7 = pnand %p4765_p6, %p4759_p3 }
  0x10   :  { %4769 = shalt.err (!%p4766_p7)
}
  0x11   :  { %s4821_s19 = smov 128   ;;  %s4822_s20 = smov 8  }
  0x12   :  { %21 = dma.hbm_to_vmem [thread:$0]  %s5302_s0, 256, %s16_s10, [#allocation3], %s4821_s19, %s4821_s19, %s4822_s20  }
  0x13   :  { %s4823_s23 = smov [#allocation5]   ;;  %s4770_s27 = scalar_lea.hbm %s5303_s1, 7552 }
  0x14   :  { %s27_s24 = sshll.u32 %s4823_s23, 4  ;;  %p4771_p8 = scmp.ne.s32.totalorder %s5303_s1, %s4770_s27  ;;  %s28_s24 = int_to_ptr.vmem [resolvable:$true] %s27_s24 }
  0x15   :  { %p4774_p9 = scmp.lt.u32.totalorder %s4770_s27, %s5303_s1 }
  0x17   :  { %p4776_p10 = pnand %p4774_p9, %p4771_p8 }
  0x19   :  { %4779 = shalt.err (!%p4776_p10)
}
  0x1a   :  { %s4780_s4 = scalar_lea.vmem %s28_s24, 7552  ;;  %p4785_p12 = scmp.lt.s32.totalorder %s28_s24, %s28_s24 }
  0x1b   :  { %p4781_p11 = scmp.ne.s32.totalorder %s28_s24, %s4780_s4  ;;  %p4786_p13 = scmp.lt.s32.totalorder %s4780_s4, %s4780_s4 }
  0x1d   :  { %p4787_p0 = por %p4786_p13, %p4785_p12 }
  0x1f   :  { %p4788_p1 = pnand %p4787_p0, %p4781_p11 }
  0x21   :  { %4791 = shalt.err (!%p4788_p1)
}
  0x22   :  { %33 = dma.hbm_to_vmem [thread:$0]  %s5303_s1, 7552, %s28_s24, [#allocation6], %s4821_s19, %s4821_s19, %s4822_s20  }
  0x23   :  { %4814 = dma.done.wait [#allocation3], 256  }
  0x24   :  { %4815 = vsyncadd [#allocation3], 4294967040 }
  0x25   :  { %4816 = dma.done.wait [#allocation6], 7552  }
  0x26   :  { %4817 = vsyncadd [#allocation6], 4294959744  ;;  %vm51_vm0 = vcmask 261120   ;;  %v42_v0 = vld [vmem:[#allocation5] sm:$0xff]  ;;  %v43_v1 = vld [vmem:[#allocation5 + $0x8] sm:$0xff]  ;;  %v4824_v10 = vmov 0.0  }
  0x27   :  { %v44_v2 = vld [vmem:[#allocation5 + $0x10] sm:$0xff]  ;;  %v4534_v3 = vpack.c.bf16 %v43_v1, %v42_v0  ;;  %v45_v4 = vld [vmem:[#allocation5 + $0x18] sm:$0xff]  ;;  %v3998_v8 = vld [vmem:[#allocation5 + $0xa0] ss:$0 sm:$0xff]  ;;  %4240 = vmatprep.subr.mxu1 %v4824_v10  ;;  %s4825_s1 = smov 104   ;;  %s4826_s6 = smov 120  }
  0x28   :  { %v4879_v5 = vld [vmem:[#allocation2] sm:$0xff]  ;;  %v4538_v6 = vpack.c.bf16 %v45_v4, %v44_v2  ;;  %v4883_v7 = vld [vmem:[#allocation2 + $0x8] sm:$0xff]  ;;  %vm4827_vm1 = vmmov 0   ;;  %s4828_s7 = smov 112   ;;  %s4829_s8 = smov 96   ;;  %vm149_vm2 = vcmask 64512  }
  0x29   :  { %4237 = vmatprep.mubr.msk.f32.mxu0 %vm51_vm0, %v4879_v5  ;;  %4535 = vmatprep.subr.bf16.mxu0 %v4534_v3  ;;  %s4830_s9 = smov 64   ;;  %s4831_s10 = smov 16   ;;  %vm1473_vm3 = vcmask 130048   ;;  %vm1475_vm4 = vcmask 195584   ;;  %vm1746_vm5 = vcmask 523264  }
  0x2a   :  { %4537 = vmatpush3.bf16.msra.mxu0 %v4534_v3  ;;  %4242 = vmatprep.mubr.msk.f32.mxu1 %vm4827_vm1, %v4824_v10  ;;  %s4832_s11 = smov 24   ;;  %s4833_s12 = smov [#allocation7]  }
  0x2b   :  { %4539 = vmatprep.subr.bf16.mxu0 %v4538_v6  ;;  %s3985_s13 = sshll.u32 %s4833_s12, 4  ;;  %s3986_s13 = int_to_ptr.vmem [resolvable:$true] %s3985_s13 }
  0x2c   :  { %s4792_s14 = scalar_lea.vmem %s3986_s13, 256  ;;  %p4797_p3 = scmp.lt.s32.totalorder %s3986_s13, %s3986_s13 }
  0x2d   :  { %p4793_p2 = scmp.ne.s32.totalorder %s3986_s13, %s4792_s14  ;;  %p4798_p4 = scmp.lt.s32.totalorder %s4792_s14, %s4792_s14 }
  0x2e   :  { %4541 = vmatpush3.bf16.msra.mxu0 %v4538_v6 }
  0x2f   :  { %4250 = vmatprep.subr.mxu0 %v4824_v10  ;;  %p4799_p5 = por %p4798_p4, %p4797_p3 }
  0x31   :  { %4238 = vmatmul.mubr.msk.f32.vlgmr.msra.gmra.mrb[0].mxu0 %vm51_vm0, %v4883_v7  ;;  %p4800_p6 = pnand %p4799_p5, %p4793_p2 }
  0x32   :  { %4252 = vmatprep.mubr.msk.f32.mxu0 %vm4827_vm1, %v4824_v10 }
 0x104   :  { %v4239_v9 = vpop.f32.mrb[0].mxu0 }
 0x105   :  { %v124_v11 = vpop.f32.mrb[1].mxu0  ;;  %v4899_v13 = vadd.f32 %v4239_v9, %v3998_v8 }
 0x106   :  { %v4889_v12 = vadd.f32 %v3998_v8, %v124_v11 }
 0x108   :  { %138 = vrot.lane.b32.xlu1 %v4889_v12, %s4825_s1  ;;  %134 = vrot.lane.b32.xlu0 %v4889_v12, %s4826_s6 }
 0x10c   :  { %141 = vrot.lane.b32.xlu1 %v4899_v13, %s4826_s6  ;;  %136 = vrot.lane.b32.xlu0 %v4889_v12, %s4828_s7 }
 0x110   :  { %145 = vrot.lane.b32.xlu1 %v4899_v13, %s4825_s1  ;;  %143 = vrot.lane.b32.xlu0 %v4899_v13, %s4828_s7 }
 0x114   :  { %147 = vrot.lane.b32.xlu0 %v4889_v12, %s4829_s8 }
 0x17a   :  { %v4911_v14 = vpop.permute.xlu1 %138  ;;  %v4913_v15 = vpop.permute.xlu0 %134 }
 0x17b   :  { %224 = vrot.lane.b32.xlu1 %v4913_v15, %s4829_s8 }
 0x17e   :  { %v4917_v16 = vpop.permute.xlu0 %136  ;;  %v4923_v17 = vpop.permute.xlu1 %141 }
 0x17f   :  { %376 = vrot.lane.b32.xlu1 %v4911_v14, %s4829_s8  ;;  %300 = vrot.lane.b32.xlu0 %v4917_v16, %s4829_s8 }
 0x182   :  { %v4925_v18 = vpop.permute.xlu0 %143  ;;  %v4931_v19 = vpop.permute.xlu1 %145 }
 0x183   :  { %528 = vrot.lane.b32.xlu1 %v4923_v17, %s4829_s8  ;;  %452 = vrot.lane.b32.xlu0 %v4899_v13, %s4829_s8 }
 0x186   :  { %v148_v20 = vpop.permute.xlu0 %147 }
 0x187   :  { %680 = vrot.lane.b32.xlu1 %v4931_v19, %s4829_s8  ;;  %604 = vrot.lane.b32.xlu0 %v4925_v18, %s4829_s8 }
 0x188   :  { %4241 = vmatpush3.xpose.msk.msra.mxu1 %vm149_vm2, %v148_v20 }
 0x189   :  { %4245 = vmatprep.subr.mxu1 %v4824_v10 }
 0x18b   :  { %4243 = vmatmul.mubr.msk.f32.vlgmr.msra.gmra.mrb[0].mxu1 %vm149_vm2, %v4889_v12 }
 0x18c   :  { %4247 = vmatprep.mubr.msk.f32.mxu1 %vm4827_vm1, %v4824_v10 }
 0x1ed   :  { %v225_v21 = vpop.permute.xlu1 %224 }
 0x1ee   :  { %4246 = vmatpush3.xpose.msk.msra.mxu1 %vm149_vm2, %v225_v21 }
 0x1ef   :  { %4255 = vmatprep.subr.mxu1 %v4824_v10 }
 0x1f1   :  { %v377_v22 = vpop.permute.xlu1 %376  ;;  %4248 = vmatmul.mubr.msk.f32.vlgmr.msra.gmra.mrb[2].mxu1 %vm149_vm2, %v4913_v15  ;;  %v301_v23 = vpop.permute.xlu0 %300 }
 0x1f2   :  { %4251 = vmatpush3.xpose.msk.msra.mxu0 %vm149_vm2, %v301_v23  ;;  %4256 = vmatpush3.xpose.msk.msra.mxu1 %vm149_vm2, %v377_v22 }
 0x1f3   :  { %4257 = vmatprep.mubr.msk.f32.mxu1 %vm4827_vm1, %v4824_v10  ;;  %4260 = vmatprep.subr.mxu0 %v4824_v10 }
 0x1f4   :  { %4265 = vmatprep.subr.mxu1 %v4824_v10 }
 0x1f5   :  { %v529_v24 = vpop.permute.xlu1 %528  ;;  %4253 = vmatmul.mubr.msk.f32.vlgmr.msra.gmra.mrb[2].mxu0 %vm149_vm2, %v4917_v16  ;;  %4258 = vmatmul.mubr.msk.f32.vlgmr.msra.gmra.mrb[4].mxu1 %vm149_vm2, %v4911_v14  ;;  %v453_v25 = vpop.permute.xlu0 %452 }
 0x1f6   :  { %4261 = vmatpush3.xpose.msk.msra.mxu0 %vm149_vm2, %v453_v25  ;;  %4266 = vmatpush3.xpose.msk.msra.mxu1 %vm149_vm2, %v529_v24 }
 0x1f7   :  { %4262 = vmatprep.mubr.msk.f32.mxu0 %vm4827_vm1, %v4824_v10  ;;  %4267 = vmatprep.mubr.msk.f32.mxu1 %vm4827_vm1, %v4824_v10 }
 0x1f8   :  { %4270 = vmatprep.subr.mxu0 %v4824_v10  ;;  %4275 = vmatprep.subr.mxu1 %v4824_v10 }
 0x1f9   :  { %v681_v26 = vpop.permute.xlu1 %680  ;;  %4263 = vmatmul.mubr.msk.f32.vlgmr.msra.gmra.mrb[4].mxu0 %vm149_vm2, %v4899_v13  ;;  %4268 = vmatmul.mubr.msk.f32.vlgmr.msra.gmra.mrb[6].mxu1 %vm149_vm2, %v4923_v17  ;;  %v605_v27 = vpop.permute.xlu0 %604 }
 0x1fa   :  { %4271 = vmatpush3.xpose.msk.msra.mxu0 %vm149_vm2, %v605_v27  ;;  %4276 = vmatpush3.xpose.msk.msra.mxu1 %vm149_vm2, %v681_v26 }
 0x1fb   :  { %4272 = vmatprep.mubr.msk.f32.mxu0 %vm4827_vm1, %v4824_v10  ;;  %4277 = vmatprep.mubr.msk.f32.mxu1 %vm4827_vm1, %v4824_v10 }
 0x1fc   :  { %4280 = vmatprep.subr.mxu0 %v4824_v10  ;;  %4285 = vmatprep.subr.mxu1 %v4824_v10 }
 0x1fd   :  { %4273 = vmatmul.mubr.msk.f32.vlgmr.msra.gmra.mrb[6].mxu0 %vm149_vm2, %v4925_v18  ;;  %4278 = vmatmul.mubr.msk.f32.vlgmr.msra.gmra.mrb[8].mxu1 %vm149_vm2, %v4931_v19 }
 0x1fe   :  { %4282 = vmatprep.mubr.msk.f32.mxu0 %vm4827_vm1, %v4824_v10  ;;  %4287 = vmatprep.mubr.msk.f32.mxu1 %vm4827_vm1, %v4824_v10 }
 0x25e   :  { %v220_v28 = vpop.f32.mrb[0].mxu1 }
 0x25f   :  { %v756_v29 = vmul.f32 0.35355338, %v220_v28  ;;  %v4244_v30 = vpop.f32.mrb[1].mxu1 }
 0x261   :  { %v764_v31 = vsel %vm149_vm2, %v756_v29, -inf }
 0x262   :  { %765 = vmax.xlane.f32.xlu0 %v764_v31 }
 0x2c4   :  { %v296_v32 = vpop.f32.mrb[2].mxu1 }
 0x2c5   :  { %v757_v33 = vmul.f32 0.35355338, %v296_v32  ;;  %v4249_v34 = vpop.f32.mrb[3].mxu1 }
 0x2c7   :  { %v767_v35 = vsel %vm149_vm2, %v757_v33, -inf }
 0x2c8   :  { %768 = vmax.xlane.f32.xlu1 %v767_v35  ;;  %v372_v36 = vpop.f32.mrb[2].mxu0  ;;  %v448_v37 = vpop.f32.mrb[4].mxu1 }
 0x2c9   :  { %v758_v38 = vmul.f32 0.35355338, %v372_v36  ;;  %v4254_v39 = vpop.f32.mrb[3].mxu0  ;;  %v4259_v40 = vpop.f32.mrb[5].mxu1  ;;  %v759_v41 = vmul.f32 0.35355338, %v448_v37 }
 0x2cb   :  { %v770_v42 = vsel %vm149_vm2, %v758_v38, -inf  ;;  %v773_v49 = vsel %vm149_vm2, %v759_v41, -inf }
 0x2cc   :  { %v600_v43 = vpop.f32.mrb[6].mxu1  ;;  %771 = vmax.xlane.f32.xlu0 %v770_v42  ;;  %v524_v44 = vpop.f32.mrb[4].mxu0 }
 0x2cd   :  { %v760_v45 = vmul.f32 0.35355338, %v524_v44  ;;  %v4264_v46 = vpop.f32.mrb[5].mxu0  ;;  %v4269_v47 = vpop.f32.mrb[7].mxu1  ;;  %v761_v48 = vmul.f32 0.35355338, %v600_v43 }
 0x2cf   :  { %v776_v50 = vsel %vm149_vm2, %v760_v45, -inf  ;;  %v779_v57 = vsel %vm149_vm2, %v761_v48, -inf }
 0x2d0   :  { %v752_v51 = vpop.f32.mrb[8].mxu1  ;;  %774 = vmax.xlane.f32.xlu0 %v773_v49  ;;  %777 = vmax.xlane.f32.xlu1 %v776_v50  ;;  %v676_v52 = vpop.f32.mrb[6].mxu0 }
 0x2d1   :  { %v762_v53 = vmul.f32 0.35355338, %v676_v52  ;;  %v4274_v54 = vpop.f32.mrb[7].mxu0  ;;  %v4279_v55 = vpop.f32.mrb[9].mxu1  ;;  %v763_v56 = vmul.f32 0.35355338, %v752_v51 }
 0x2d3   :  { %v782_v58 = vsel %vm149_vm2, %v762_v53, -inf  ;;  %v785_v59 = vsel %vm149_vm2, %v763_v56, -inf }
 0x2d4   :  { %780 = vmax.xlane.f32.xlu0 %v779_v57  ;;  %783 = vmax.xlane.f32.xlu1 %v782_v58 }
 0x2d8   :  { %786 = vmax.xlane.f32.xlu0 %v785_v59 }
 0x2e5   :  { %852 = vrot.lane.b32.xlu1 %v4889_v12, %s4830_s9 }
 0x2e9   :  { %1004 = vrot.lane.b32.xlu1 %v4917_v16, %s4830_s9 }
 0x2ed   :  { %1080 = vrot.lane.b32.xlu1 %v4911_v14, %s4830_s9 }
 0x2ee   :  { %928 = vrot.lane.b32.xlu0 %v4913_v15, %s4830_s9 }
 0x2ef   :  { %v766_v60 = vpop.xlane.xlu0 %765 }
 0x2f0   :  { %v788_v61 = vsub.f32 %v756_v29, %v766_v60 }
 0x2f1   :  { %1232 = vrot.lane.b32.xlu1 %v4923_v17, %s4830_s9 }
 0x2f2   :  { %1156 = vrot.lane.b32.xlu0 %v4899_v13, %s4830_s9  ;;  %v796_v62 = vmul.f32 1.442695, %v788_v61 }
 0x2f4   :  { %4660 = vpow2.f32 %v796_v62 }
 0x2fe   :  { %v5005_v63 = vpop.eup %4660 }
 0x2ff   :  { %v812_v0 = vsel %vm149_vm2, %v5005_v63, 0.0 }
 0x315   :  { %813 = vadd.xlane.f32.xlu1 %v812_v0 }
 0x355   :  { %v769_v1 = vpop.xlane.xlu1 %768 }
 0x356   :  { %v789_v2 = vsub.f32 %v757_v33, %v769_v1 }
 0x358   :  { %v798_v3 = vmul.f32 1.442695, %v789_v2 }
 0x359   :  { %v772_v4 = vpop.xlane.xlu0 %771 }
 0x35a   :  { %4662 = vpow2.f32 %v798_v3  ;;  %v790_v6 = vsub.f32 %v758_v38, %v772_v4 }
 0x35c   :  { %v800_v8 = vmul.f32 1.442695, %v790_v6 }
 0x35d   :  { %v778_v9 = vpop.xlane.xlu1 %777  ;;  %v775_v11 = vpop.xlane.xlu0 %774 }
 0x35e   :  { %4664 = vpow2.f32 %v800_v8  ;;  %v792_v12 = vsub.f32 %v760_v45, %v778_v9  ;;  %v791_v13 = vsub.f32 %v759_v41, %v775_v11 }
 0x360   :  { %v804_v14 = vmul.f32 1.442695, %v792_v12  ;;  %v802_v15 = vmul.f32 1.442695, %v791_v13  ;;  %v1492_v12 = vld [vmem:[#allocation5 + $0x20] sm:$0xff]  ;;  %v1493_v13 = vld [vmem:[#allocation5 + $0x28] sm:$0xff] }
 0x361   :  { %v784_v16 = vpop.xlane.xlu1 %783  ;;  %v781_v17 = vpop.xlane.xlu0 %780 }
 0x362   :  { %4666 = vpow2.f32 %v804_v14  ;;  %v794_v20 = vsub.f32 %v762_v53, %v784_v16  ;;  %v793_v21 = vsub.f32 %v761_v48, %v781_v17  ;;  %v4542_v14 = vpack.c.bf16 %v1493_v13, %v1492_v12  ;;  %v1494_v17 = vld [vmem:[#allocation5 + $0x30] sm:$0xff]  ;;  %v4028_v13 = vld [vmem:[#allocation5 + $0xa2] ss:$0 sm:$0xff] }
 0x363   :  { %4668 = vpow2.f32 %v802_v15 }
 0x364   :  { %v4663_v22 = vpop.eup %4662  ;;  %v808_v23 = vmul.f32 1.442695, %v794_v20  ;;  %v806_v24 = vmul.f32 1.442695, %v793_v21  ;;  %v1495_v20 = vld [vmem:[#allocation5 + $0x38] sm:$0xff] }
 0x365   :  { %v853_v25 = vpop.permute.xlu1 %852  ;;  %v787_v26 = vpop.xlane.xlu0 %786  ;;  %v815_v27 = vsel %vm149_vm2, %v4663_v22, 0.0  ;;  %v4546_v21 = vpack.c.bf16 %v1495_v20, %v1494_v17 }
 0x366   :  { %4670 = vpow2.f32 %v808_v23  ;;  %v795_v28 = vsub.f32 %v763_v56, %v787_v26  ;;  %816 = vadd.xlane.f32.xlu0 %v815_v27  ;;  %4281 = vmatpush3.msra.mxu0 %v853_v25 }
 0x367   :  { %4672 = vpow2.f32 %v806_v24  ;;  %4290 = vmatprep.subr.mxu0 %v4824_v10 }
 0x368   :  { %v4665_v29 = vpop.eup %4664  ;;  %v810_v30 = vmul.f32 1.442695, %v795_v28 }
 0x369   :  { %v929_v31 = vpop.permute.xlu0 %928  ;;  %v818_v32 = vsel %vm149_vm2, %v4665_v29, 0.0  ;;  %v1005_v43 = vpop.permute.xlu1 %1004 }
 0x36a   :  { %4674 = vpow2.f32 %v810_v30  ;;  %819 = vadd.xlane.f32.xlu1 %v818_v32  ;;  %4286 = vmatpush3.msra.mxu1 %v929_v31 }
 0x36b   :  { %4295 = vmatprep.subr.mxu1 %v4824_v10 }
 0x36c   :  { %v4667_v33 = vpop.eup %4666 }
 0x36d   :  { %v4669_v34 = vpop.eup %4668  ;;  %v824_v35 = vsel %vm149_vm2, %v4667_v33, 0.0  ;;  %v1081_v44 = vpop.permute.xlu1 %1080 }
 0x36e   :  { %825 = vadd.xlane.f32.xlu1 %v824_v35  ;;  %v821_v36 = vsel %vm149_vm2, %v4669_v34, 0.0 }
 0x36f   :  { %822 = vadd.xlane.f32.xlu0 %v821_v36 }
 0x370   :  { %v4671_v37 = vpop.eup %4670 }
 0x371   :  { %v4673_v38 = vpop.eup %4672  ;;  %v830_v39 = vsel %vm149_vm2, %v4671_v37, 0.0  ;;  %v1233_v45 = vpop.permute.xlu1 %1232 }
 0x372   :  { %831 = vadd.xlane.f32.xlu1 %v830_v39  ;;  %v827_v40 = vsel %vm149_vm2, %v4673_v38, 0.0 }
 0x373   :  { %828 = vadd.xlane.f32.xlu0 %v827_v40 }
 0x374   :  { %v5017_v41 = vpop.eup %4674 }
 0x375   :  { %v833_v42 = vsel %vm149_vm2, %v5017_v41, 0.0 }
 0x377   :  { %834 = vadd.xlane.f32.xlu0 %v833_v42 }
 0x383   :  { %1384 = vrot.lane.b32.xlu1 %v4931_v19, %s4830_s9  ;;  %v1157_v19 = vpop.permute.xlu0 %1156 }
 0x38d   :  { %1308 = vrot.lane.b32.xlu0 %v4925_v18, %s4830_s9 }
 0x3a2   :  { %v814_v46 = vpop.xlane.xlu1 %813 }
 0x3a3   :  { %4676 = vrcp.f32 %v814_v46  ;;  %v4025_v46 = vld [vmem:[#allocation5 + $0xa1] ss:$0 sm:$0xff] }
 0x3ad   :  { %v4677_v47 = vpop.eup %4676 }
 0x3ae   :  { %v844_v48 = vmul.f32 %v4677_v47, %v5005_v63 }
 0x3b0   :  { %4283 = vmatmul.mubr.msk.f32.vlgmr.msra.gmra.mrb[8].mxu0 %vm149_vm2, %v844_v48 }
 0x3b1   :  { %4291 = vmatpush3.msra.mxu0 %v1005_v43  ;;  %4292 = vmatprep.mubr.msk.f32.mxu0 %vm4827_vm1, %v4824_v10 }
 0x3b2   :  { %4300 = vmatprep.subr.mxu0 %v4824_v10 }
 0x3f3   :  { %v817_v49 = vpop.xlane.xlu0 %816 }
 0x3f4   :  { %4678 = vrcp.f32 %v817_v49 }
 0x3f7   :  { %v820_v18 = vpop.xlane.xlu1 %819 }
 0x3f8   :  { %4680 = vrcp.f32 %v820_v18 }
 0x3fb   :  { %v826_v50 = vpop.xlane.xlu1 %825 }
 0x3fc   :  { %4682 = vrcp.f32 %v826_v50  ;;  %v823_v51 = vpop.xlane.xlu0 %822 }
 0x3fd   :  { %4684 = vrcp.f32 %v823_v51 }
 0x3fe   :  { %v4679_v52 = vpop.eup %4678 }
 0x3ff   :  { %v845_v53 = vmul.f32 %v4679_v52, %v4663_v22  ;;  %v832_v54 = vpop.xlane.xlu1 %831 }
 0x400   :  { %4686 = vrcp.f32 %v832_v54  ;;  %v829_v55 = vpop.xlane.xlu0 %828 }
 0x401   :  { %4688 = vrcp.f32 %v829_v55  ;;  %4288 = vmatmul.mubr.msk.f32.vlgmr.msra.gmra.mrb[10].mxu1 %vm149_vm2, %v845_v53 }
 0x402   :  { %v4681_v56 = vpop.eup %4680  ;;  %4296 = vmatpush3.msra.mxu1 %v1081_v44  ;;  %4297 = vmatprep.mubr.msk.f32.mxu1 %vm4827_vm1, %v4824_v10 }
 0x403   :  { %v846_v57 = vmul.f32 %v4681_v56, %v4665_v29  ;;  %4305 = vmatprep.subr.mxu1 %v4824_v10  ;;  %v1385_v4 = vpop.permute.xlu1 %1384 }
 0x404   :  { %v835_v58 = vpop.xlane.xlu0 %834 }
 0x405   :  { %4690 = vrcp.f32 %v835_v58  ;;  %4293 = vmatmul.mubr.msk.f32.vlgmr.msra.gmra.mrb[10].mxu0 %vm149_vm2, %v846_v57 }
 0x406   :  { %v4683_v59 = vpop.eup %4682  ;;  %4301 = vmatpush3.msra.mxu0 %v1157_v19  ;;  %4302 = vmatprep.mubr.msk.f32.mxu0 %vm4827_vm1, %v4824_v10 }
 0x407   :  { %v4685_v60 = vpop.eup %4684  ;;  %v848_v61 = vmul.f32 %v4683_v59, %v4667_v33  ;;  %4310 = vmatprep.subr.mxu0 %v4824_v10 }
 0x408   :  { %v847_v62 = vmul.f32 %v4685_v60, %v4669_v34  ;;  %v1309_v63 = vpop.permute.xlu0 %1308 }
 0x409   :  { %4303 = vmatmul.mubr.msk.f32.vlgmr.msra.gmra.mrb[12].mxu0 %vm149_vm2, %v848_v61 }
 0x40a   :  { %v4687_v0 = vpop.eup %4686  ;;  %4298 = vmatmul.mubr.msk.f32.vlgmr.msra.gmra.mrb[12].mxu1 %vm149_vm2, %v847_v62  ;;  %4311 = vmatpush3.msra.mxu0 %v1309_v63  ;;  %v1626_v62 = vld [vmem:[#allocation5 + $0x48] sm:$0xff] }
 0x40b   :  { %v4689_v1 = vpop.eup %4688  ;;  %v850_v2 = vmul.f32 %v4687_v0, %v4671_v37  ;;  %4306 = vmatpush3.msra.mxu1 %v1233_v45  ;;  %4307 = vmatprep.mubr.msk.f32.mxu1 %vm4827_vm1, %v4824_v10  ;;  %v1627_v0 = vld [vmem:[#allocation5 + $0x50] sm:$0xff] }
 0x40c   :  { %v849_v3 = vmul.f32 %v4689_v1, %v4673_v38  ;;  %4312 = vmatprep.mubr.msk.f32.mxu0 %vm4827_vm1, %v4824_v10  ;;  %4315 = vmatprep.subr.mxu1 %v4824_v10  ;;  %v1628_v1 = vld [vmem:[#allocation5 + $0x58] sm:$0xff] }
 0x40d   :  { %4313 = vmatmul.mubr.msk.f32.vlgmr.msra.gmra.mrb[14].mxu0 %vm149_vm2, %v850_v2  ;;  %4543 = vmatprep.subr.bf16.mxu0 %v4542_v14  ;;  %v4554_v2 = vpack.c.bf16 %v1628_v1, %v1627_v0 }
 0x40e   :  { %4308 = vmatmul.mubr.msk.f32.vlgmr.msra.gmra.mrb[14].mxu1 %vm149_vm2, %v849_v3  ;;  %4545 = vmatpush3.bf16.msra.mxu0 %v4542_v14 }
 0x40f   :  { %v4691_v6 = vpop.eup %4690  ;;  %4316 = vmatpush3.msra.mxu1 %v1385_v4  ;;  %4317 = vmatprep.mubr.msk.f32.mxu1 %vm4827_vm1, %v4824_v10 }
 0x410   :  { %v851_v8 = vmul.f32 %v4691_v6, %v5017_v41  ;;  %4547 = vmatprep.subr.bf16.mxu0 %v4546_v21 }
 0x412   :  { %4318 = vmatmul.mubr.msk.f32.vlgmr.msra.gmra.mrb[16].mxu1 %vm149_vm2, %v851_v8  ;;  %4549 = vmatpush3.bf16.msra.mxu0 %v4546_v21 }
 0x483   :  { %v924_v9 = vpop.f32.mrb[8].mxu0 }
 0x484   :  { %v4284_v11 = vpop.f32.mrb[9].mxu0 }
 0x4d4   :  { %v1000_v15 = vpop.f32.mrb[10].mxu1 }
 0x4d5   :  { %1461 = vrot.lane.b32.xlu0 %v1000_v15, %s4822_s20  ;;  %v4289_v16 = vpop.f32.mrb[11].mxu1  ;;  %v4029_v15 = vld [vmem:[#allocation5 + $0xa3] ss:$0 sm:$0xff] }
 0x4d8   :  { %v1076_v22 = vpop.f32.mrb[10].mxu0 }
 0x4d9   :  { %1465 = vrot.lane.b32.xlu1 %v1076_v22, %s4831_s10  ;;  %v4294_v23 = vpop.f32.mrb[11].mxu0 }
 0x4dc   :  { %v1228_v24 = vpop.f32.mrb[12].mxu0 }
 0x4dd   :  { %v1152_v25 = vpop.f32.mrb[12].mxu1  ;;  %v4304_v26 = vpop.f32.mrb[13].mxu0 }
 0x4de   :  { %1469 = vrot.lane.b32.xlu1 %v1152_v25, %s4832_s11  ;;  %v4299_v27 = vpop.f32.mrb[13].mxu1  ;;  %v1734_v25 = vld [vmem:[#allocation5 + $0x68] sm:$0xff] }
 0x4df   :  { %v1735_v27 = vld [vmem:[#allocation5 + $0x70] sm:$0xff] }
 0x4e0   :  { %v1380_v28 = vpop.f32.mrb[14].mxu0 }
 0x4e1   :  { %v1304_v29 = vpop.f32.mrb[14].mxu1  ;;  %v4314_v30 = vpop.f32.mrb[15].mxu0 }
 0x4e2   :  { %1478 = vrot.lane.b32.xlu0 %v1304_v29, %s4822_s20  ;;  %v4309_v31 = vpop.f32.mrb[15].mxu1  ;;  %v1737_v30 = vld [vmem:[#allocation5 + $0x80] sm:$0xff] }
 0x4e3   :  { %v1738_v31 = vld [vmem:[#allocation5 + $0x88] sm:$0xff] }
 0x4e5   :  { %v1456_v32 = vpop.f32.mrb[16].mxu1 }
 0x4e6   :  { %1486 = vrot.lane.b32.xlu1 %v1456_v32, %s4832_s11  ;;  %v4319_v33 = vpop.f32.mrb[17].mxu1  ;;  %1482 = vrot.lane.b32.xlu0 %v1380_v28, %s4831_s10  ;;  %v1736_v28 = vld [vmem:[#allocation5 + $0x78] sm:$0xff]  ;;  %v4566_v32 = vpack.c.bf16 %v1738_v31, %v1737_v30 }
 0x4e7   :  { %v4562_v29 = vpack.c.bf16 %v1736_v28, %v1735_v27  ;;  %v1739_v33 = vld [vmem:[#allocation5 + $0x90] sm:$0xff]  ;;  %v4036_v28 = vld [vmem:[#allocation5 + $0xa6] ss:$0 sm:$0xff] }
 0x547   :  { %v1462_v35 = vpop.permute.xlu0 %1461 }
 0x548   :  { %v1472_v36 = vsel %vm149_vm2, %v924_v9, %v1462_v35 }
 0x54b   :  { %v1466_v34 = vpop.permute.xlu1 %1465 }
 0x54c   :  { %v1474_v37 = vsel %vm1473_vm3, %v1472_v36, %v1466_v34  ;;  %v1740_v34 = vld [vmem:[#allocation5 + $0x98] sm:$0xff]  ;;  %v4030_v36 = vld [vmem:[#allocation5 + $0xa4] ss:$0 sm:$0xff] }
 0x54d   :  { %v4570_v35 = vpack.c.bf16 %v1740_v34, %v1739_v33 }
 0x550   :  { %v1470_v38 = vpop.permute.xlu1 %1469 }
 0x551   :  { %v1476_v39 = vsel %vm1475_vm4, %v1474_v37, %v1470_v38 }
 0x552   :  { %4328 = vmatprep.mubr.msk.f32.mxu0 %vm51_vm0, %v1476_v39 }
 0x554   :  { %v1479_v40 = vpop.permute.xlu0 %1478 }
 0x555   :  { %v1489_v41 = vsel %vm149_vm2, %v1228_v24, %v1479_v40  ;;  %v1733_v24 = vld [vmem:[#allocation5 + $0x60] sm:$0xff] }
 0x556   :  { %v4558_v26 = vpack.c.bf16 %v1734_v25, %v1733_v24 }
 0x558   :  { %v1487_v42 = vpop.permute.xlu1 %1486  ;;  %v1483_v43 = vpop.permute.xlu0 %1482  ;;  %4559 = vmatprep.subr.bf16.mxu0 %v4558_v26 }
 0x559   :  { %v1490_v44 = vsel %vm1473_vm3, %v1489_v41, %v1483_v43 }
 0x55a   :  { %v1491_v45 = vsel %vm1475_vm4, %v1490_v44, %v1487_v42 }
 0x55b   :  { %4329 = vmatmul.mubr.msk.f32.vlgmr.msra.gmra.mrb[16].mxu0 %vm51_vm0, %v1491_v45 }
 0x55c   :  { %4561 = vmatpush3.bf16.msra.mxu0 %v4558_v26 }
 0x55d   :  { %4563 = vmatprep.subr.bf16.mxu0 %v4562_v29 }
 0x560   :  { %4565 = vmatpush3.bf16.msra.mxu0 %v4562_v29 }
 0x561   :  { %4567 = vmatprep.subr.bf16.mxu0 %v4566_v32 }
 0x564   :  { %4569 = vmatpush3.bf16.msra.mxu0 %v4566_v32  ;;  %v4037_v32 = vld [vmem:[#allocation5 + $0xa7] ss:$0 sm:$0xff] }
 0x565   :  { %4571 = vmatprep.subr.bf16.mxu0 %v4570_v35 }
 0x568   :  { %4573 = vmatpush3.bf16.msra.mxu0 %v4570_v35 }
 0x569   :  { %4382 = vmatprep.subr.mxu0 %v4824_v10 }
 0x62e   :  { %v4330_v47 = vpop.f32.mrb[16].mxu0 }
 0x62f   :  { %v1579_v48 = vadd.f32 %v4330_v47, %v4025_v46  ;;  %v1573_v19 = vpop.f32.mrb[17].mxu0 }
 0x630   :  { %v1574_v49 = vadd.f32 %v4025_v46, %v1573_v19 }
 0x631   :  { %v1583_v18 = vadd.f32 %v1579_v48, %v4883_v7 }
 0x632   :  { %v1582_v50 = vadd.f32 %v1574_v49, %v4879_v5  ;;  %v1625_v5 = vld [vmem:[#allocation5 + $0x40] sm:$0xff] }
 0x633   :  { %v1589_v51 = vsel %vm51_vm0, %v1583_v18, 0.0  ;;  %v4550_v63 = vpack.c.bf16 %v1626_v62, %v1625_v5 }
 0x634   :  { %1590 = vadd.xlane.f32.xlu1 %v1589_v51  ;;  %v1586_v52 = vsel %vm51_vm0, %v1582_v50, 0.0 }
 0x635   :  { %1587 = vadd.xlane.f32.xlu0 %v1586_v52  ;;  %4551 = vmatprep.subr.bf16.mxu1 %v4550_v63 }
 0x636   :  { %4553 = vmatpush3.bf16.msra.mxu1 %v4550_v63 }
 0x637   :  { %4555 = vmatprep.subr.bf16.mxu1 %v4554_v2 }
 0x63a   :  { %4557 = vmatpush3.bf16.msra.mxu1 %v4554_v2 }
 0x6c1   :  { %v1591_v53 = vpop.xlane.xlu1 %1590 }
 0x6c2   :  { %v1594_v54 = vmul.f32 0.03125, %v1591_v53  ;;  %v1588_v55 = vpop.xlane.xlu0 %1587 }
 0x6c3   :  { %v1593_v56 = vmul.f32 0.03125, %v1588_v55 }
 0x6c4   :  { %v1596_v57 = vsub.f32 %v1583_v18, %v1594_v54 }
 0x6c5   :  { %v1595_v58 = vsub.f32 %v1582_v50, %v1593_v56 }
 0x6c6   :  { %v1598_v61 = vmul.f32 %v1596_v57, %v1596_v57 }
 0x6c7   :  { %v1597_v59 = vmul.f32 %v1595_v58, %v1595_v58 }
 0x6c8   :  { %v1602_v7 = vsel %vm51_vm0, %v1598_v61, 0.0 }
 0x6c9   :  { %v1599_v60 = vsel %vm51_vm0, %v1597_v59, 0.0 }
 0x6ca   :  { %1600 = vadd.xlane.f32.xlu0 %v1599_v60 }
 0x6ce   :  { %1603 = vadd.xlane.f32.xlu0 %v1602_v7 }
 0x757   :  { %v1601_v3 = vpop.xlane.xlu0 %1600 }
 0x758   :  { %v1605_v4 = vmul.f32 0.03125, %v1601_v3 }
 0x75a   :  { %v1607_v6 = vadd.f32 1e-12, %v1605_v4 }
 0x75b   :  { %v1604_v8 = vpop.xlane.xlu0 %1603 }
 0x75c   :  { %4692 = vrsqrt.f32 %v1607_v6  ;;  %v1606_v9 = vmul.f32 0.03125, %v1604_v8 }
 0x75e   :  { %v1608_v11 = vadd.f32 1e-12, %v1606_v9 }
 0x760   :  { %4694 = vrsqrt.f32 %v1608_v11 }
 0x766   :  { %v4693_v12 = vpop.eup %4692 }
 0x767   :  { %v1611_v14 = vmul.f32 %v4693_v12, %v1595_v58 }
 0x769   :  { %v1617_v16 = vmul.f32 %v4028_v13, %v1611_v14  ;;  %v1871_v14 = vld [vmem:[#allocation5 + $0xb0] sm:$0xff] }
 0x76a   :  { %v4695_v17 = vpop.eup %4694 }
 0x76b   :  { %v1612_v20 = vmul.f32 %v4695_v17, %v1596_v57  ;;  %v1623_v21 = vadd.f32 %v4029_v15, %v1617_v16  ;;  %v4033_v57 = vld [vmem:[#allocation5 + $0xa5] ss:$0 sm:$0xff]  ;;  %v1872_v16 = vld [vmem:[#allocation5 + $0xb8] sm:$0xff] }
 0x76c   :  { %v1873_v17 = vld [vmem:[#allocation5 + $0xc0] sm:$0xff] }
 0x76d   :  { %v1618_v22 = vmul.f32 %v4028_v13, %v1612_v20  ;;  %4339 = vmatprep.mubr.msk.f32.mxu1 %vm51_vm0, %v1623_v21  ;;  %v1870_v13 = vld [vmem:[#allocation5 + $0xa8] sm:$0xff]  ;;  %v4578_v20 = vpack.c.bf16 %v1873_v17, %v1872_v16 }
 0x76f   :  { %v1624_v23 = vadd.f32 %v4029_v15, %v1618_v22  ;;  %v4574_v15 = vpack.c.bf16 %v1871_v14, %v1870_v13 }
 0x771   :  { %4340 = vmatmul.mubr.msk.f32.vlgmr.msra.gmra.mrb[18].mxu1 %vm51_vm0, %v1624_v23  ;;  %4575 = vmatprep.subr.bf16.mxu1 %v4574_v15 }
 0x772   :  { %4577 = vmatpush3.bf16.msra.mxu1 %v4574_v15 }
 0x773   :  { %4579 = vmatprep.subr.bf16.mxu1 %v4578_v20 }
 0x776   :  { %4581 = vmatpush3.bf16.msra.mxu1 %v4578_v20 }
 0x777   :  { %4372 = vmatprep.subr.mxu1 %v4824_v10 }
 0x844   :  { %v4341_v37 = vpop.f32.mrb[18].mxu1 }
 0x845   :  { %v1712_v38 = vadd.f32 %v4341_v37, %v4030_v36  ;;  %v1706_v39 = vpop.f32.mrb[19].mxu1  ;;  %v4038_v37 = vld [vmem:[#allocation5 + $0x148] ss:$0 sm:$0xff] }
 0x846   :  { %v1707_v40 = vadd.f32 %v4030_v36, %v1706_v39 }
 0x847   :  { %v1718_v41 = vmul.f32 0.044715, %v1712_v38  ;;  %v1716_v54 = vmul.f32 0.5, %v1712_v38 }
 0x848   :  { %v1717_v42 = vmul.f32 0.044715, %v1707_v40  ;;  %v1715_v52 = vmul.f32 0.5, %v1707_v40 }
 0x849   :  { %v1720_v43 = vmul.f32 %v1718_v41, %v1712_v38 }
 0x84a   :  { %v1719_v44 = vmul.f32 %v1717_v42, %v1707_v40 }
 0x84b   :  { %v1722_v45 = vmul.f32 %v1720_v43, %v1712_v38 }
 0x84c   :  { %v1721_v46 = vmul.f32 %v1719_v44, %v1707_v40 }
 0x84d   :  { %v1724_v47 = vadd.f32 %v1722_v45, %v1712_v38 }
 0x84e   :  { %v1723_v48 = vadd.f32 %v1721_v46, %v1707_v40 }
 0x84f   :  { %v1726_v19 = vmul.f32 0.7978846, %v1724_v47 }
 0x850   :  { %v1725_v49 = vmul.f32 0.7978846, %v1723_v48 }
 0x851   :  { %4696 = vtanh.f32 %v1726_v19 }
 0x852   :  { %4698 = vtanh.f32 %v1725_v49 }
 0x85b   :  { %v4697_v18 = vpop.eup %4696 }
 0x85c   :  { %v4699_v50 = vpop.eup %4698  ;;  %v1730_v51 = vadd.f32 1.0, %v4697_v18 }
 0x85d   :  { %v1729_v53 = vadd.f32 1.0, %v4699_v50 }
 0x85e   :  { %v1732_v56 = vmul.f32 %v1730_v51, %v1716_v54 }
 0x85f   :  { %v1731_v55 = vmul.f32 %v1729_v53, %v1715_v52 }
 0x861   :  { %4358 = vmatprep.mubr.msk.f32.mxu0 %vm1746_vm5, %v1731_v55 }
 0x862   :  { %4359 = vmatmul.mubr.msk.f32.vlgmr.msra.gmra.mrb[18].mxu0 %vm1746_vm5, %v1732_v56 }
 0x863   :  { %4384 = vmatprep.mubr.msk.f32.mxu0 %vm4827_vm1, %v4824_v10 }
 0x935   :  { %v4360_v58 = vpop.f32.mrb[18].mxu0 }
 0x936   :  { %v1825_v59 = vadd.f32 %v4360_v58, %v4033_v57  ;;  %v1819_v60 = vpop.f32.mrb[19].mxu0 }
 0x937   :  { %v1820_v61 = vadd.f32 %v4033_v57, %v1819_v60 }
 0x938   :  { %v1829_v7 = vadd.f32 %v1825_v59, %v1624_v23 }
 0x939   :  { %v1828_v5 = vadd.f32 %v1820_v61, %v1623_v21 }
 0x93a   :  { %v1835_v62 = vsel %vm51_vm0, %v1829_v7, 0.0 }
 0x93b   :  { %1836 = vadd.xlane.f32.xlu0 %v1835_v62  ;;  %v1832_v63 = vsel %vm51_vm0, %v1828_v5, 0.0 }
 0x93c   :  { %1833 = vadd.xlane.f32.xlu1 %v1832_v63 }
 0x9c8   :  { %v1837_v0 = vpop.xlane.xlu0 %1836 }
 0x9c9   :  { %v1839_v1 = vmul.f32 0.03125, %v1837_v0  ;;  %v1834_v2 = vpop.xlane.xlu1 %1833 }
 0x9ca   :  { %v1838_v3 = vmul.f32 0.03125, %v1834_v2 }
 0x9cb   :  { %v1841_v4 = vsub.f32 %v1829_v7, %v1839_v1 }
 0x9cc   :  { %v1840_v6 = vsub.f32 %v1828_v5, %v1838_v3 }
 0x9cd   :  { %v1843_v8 = vmul.f32 %v1841_v4, %v1841_v4 }
 0x9ce   :  { %v1842_v9 = vmul.f32 %v1840_v6, %v1840_v6 }
 0x9cf   :  { %v1847_v11 = vsel %vm51_vm0, %v1843_v8, 0.0 }
 0x9d0   :  { %1848 = vadd.xlane.f32.xlu0 %v1847_v11  ;;  %v1844_v12 = vsel %vm51_vm0, %v1842_v9, 0.0 }
 0x9d1   :  { %1845 = vadd.xlane.f32.xlu1 %v1844_v12 }
 0xa5d   :  { %v1849_v21 = vpop.xlane.xlu0 %1848 }
 0xa5e   :  { %v1851_v22 = vmul.f32 0.03125, %v1849_v21  ;;  %v1846_v23 = vpop.xlane.xlu1 %1845 }
 0xa5f   :  { %v1850_v24 = vmul.f32 0.03125, %v1846_v23 }
 0xa60   :  { %v1853_v25 = vadd.f32 1e-12, %v1851_v22 }
 0xa61   :  { %v1852_v26 = vadd.f32 1e-12, %v1850_v24 }
 0xa62   :  { %4700 = vrsqrt.f32 %v1853_v25 }
 0xa63   :  { %4702 = vrsqrt.f32 %v1852_v26 }
 0xa6c   :  { %v4701_v27 = vpop.eup %4700 }
 0xa6d   :  { %v4703_v29 = vpop.eup %4702  ;;  %v1857_v30 = vmul.f32 %v4701_v27, %v1841_v4 }
 0xa6e   :  { %v1856_v31 = vmul.f32 %v4703_v29, %v1840_v6 }
 0xa6f   :  { %v1863_v33 = vmul.f32 %v4036_v28, %v1857_v30 }
 0xa70   :  { %v1862_v34 = vmul.f32 %v4036_v28, %v1856_v31 }
 0xa71   :  { %v5085_v36 = vadd.f32 %v4037_v32, %v1863_v33 }
 0xa72   :  { %v5083_v35 = vadd.f32 %v4037_v32, %v1862_v34 }
 0xa74   :  { %4369 = vmatprep.mubr.msk.f32.mxu1 %vm51_vm0, %v5083_v35 }
 0xa75   :  { %4370 = vmatmul.mubr.msk.f32.vlgmr.msra.gmra.mrb[20].mxu1 %vm51_vm0, %v5085_v36 }
 0xa76   :  { %4374 = vmatprep.mubr.msk.f32.mxu1 %vm4827_vm1, %v4824_v10 }
 0xb48   :  { %v4371_v38 = vpop.f32.mrb[20].mxu1 }
 0xb49   :  { %v1951_v39 = vpop.f32.mrb[21].mxu1  ;;  %v5099_v41 = vadd.f32 %v4371_v38, %v4038_v37 }
 0xb4a   :  { %v5093_v40 = vadd.f32 %v4038_v37, %v1951_v39 }
 0xb4c   :  { %1963 = vrot.lane.b32.xlu0 %v5093_v40, %s4828_s7  ;;  %1961 = vrot.lane.b32.xlu1 %v5093_v40, %s4826_s6 }
 0xb50   :  { %1970 = vrot.lane.b32.xlu0 %v5099_v41, %s4828_s7  ;;  %1965 = vrot.lane.b32.xlu1 %v5093_v40, %s4825_s1 }
 0xb54   :  { %1974 = vrot.lane.b32.xlu0 %v5093_v40, %s4829_s8  ;;  %1968 = vrot.lane.b32.xlu1 %v5099_v41, %s4826_s6 }
 0xb58   :  { %1972 = vrot.lane.b32.xlu1 %v5099_v41, %s4825_s1 }
 0xbbe   :  { %v5111_v42 = vpop.permute.xlu0 %1963  ;;  %v5113_v43 = vpop.permute.xlu1 %1961 }
 0xbbf   :  { %2126 = vrot.lane.b32.xlu0 %v5111_v42, %s4829_s8  ;;  %2050 = vrot.lane.b32.xlu1 %v5113_v43, %s4829_s8 }
 0xbc2   :  { %v5119_v44 = vpop.permute.xlu0 %1970  ;;  %v5121_v45 = vpop.permute.xlu1 %1965 }
 0xbc3   :  { %2278 = vrot.lane.b32.xlu0 %v5099_v41, %s4829_s8  ;;  %2202 = vrot.lane.b32.xlu1 %v5121_v45, %s4829_s8 }
 0xbc6   :  { %v1975_v46 = vpop.permute.xlu0 %1974  ;;  %v5127_v47 = vpop.permute.xlu1 %1968 }
 0xbc7   :  { %2430 = vrot.lane.b32.xlu0 %v5119_v44, %s4829_s8  ;;  %4373 = vmatpush3.xpose.msk.msra.mxu1 %vm149_vm2, %v1975_v46 }
 0xbc8   :  { %2354 = vrot.lane.b32.xlu1 %v5127_v47, %s4829_s8  ;;  %4377 = vmatprep.subr.mxu1 %v4824_v10 }
 0xbca   :  { %4375 = vmatmul.mubr.msk.f32.vlgmr.msra.gmra.mrb[22].mxu1 %vm149_vm2, %v5093_v40  ;;  %v5137_v48 = vpop.permute.xlu1 %1972 }
 0xbcb   :  { %4379 = vmatprep.mubr.msk.f32.mxu1 %vm4827_vm1, %v4824_v10 }
 0xbcc   :  { %2506 = vrot.lane.b32.xlu1 %v5137_v48, %s4829_s8 }
 0xc31   :  { %v2127_v19 = vpop.permute.xlu0 %2126  ;;  %v2051_v49 = vpop.permute.xlu1 %2050 }
 0xc32   :  { %4378 = vmatpush3.xpose.msk.msra.mxu1 %vm149_vm2, %v2051_v49  ;;  %4383 = vmatpush3.xpose.msk.msra.mxu0 %vm149_vm2, %v2127_v19 }
 0xc33   :  { %4392 = vmatprep.subr.mxu0 %v4824_v10  ;;  %4387 = vmatprep.subr.mxu1 %v4824_v10 }
 0xc35   :  { %4385 = vmatmul.mubr.msk.f32.vlgmr.msra.gmra.mrb[20].mxu0 %vm149_vm2, %v5111_v42  ;;  %v2279_v18 = vpop.permute.xlu0 %2278  ;;  %4380 = vmatmul.mubr.msk.f32.vlgmr.msra.gmra.mrb[24].mxu1 %vm149_vm2, %v5113_v43  ;;  %v2203_v50 = vpop.permute.xlu1 %2202 }
 0xc36   :  { %4388 = vmatpush3.xpose.msk.msra.mxu1 %vm149_vm2, %v2203_v50  ;;  %4393 = vmatpush3.xpose.msk.msra.mxu0 %vm149_vm2, %v2279_v18 }
 0xc37   :  { %4389 = vmatprep.mubr.msk.f32.mxu1 %vm4827_vm1, %v4824_v10  ;;  %4394 = vmatprep.mubr.msk.f32.mxu0 %vm4827_vm1, %v4824_v10 }
 0xc38   :  { %4402 = vmatprep.subr.mxu0 %v4824_v10  ;;  %4397 = vmatprep.subr.mxu1 %v4824_v10 }
 0xc39   :  { %4395 = vmatmul.mubr.msk.f32.vlgmr.msra.gmra.mrb[22].mxu0 %vm149_vm2, %v5099_v41  ;;  %v2431_v51 = vpop.permute.xlu0 %2430  ;;  %4390 = vmatmul.mubr.msk.f32.vlgmr.msra.gmra.mrb[26].mxu1 %vm149_vm2, %v5121_v45 }
 0xc3a   :  { %v2355_v52 = vpop.permute.xlu1 %2354  ;;  %4403 = vmatpush3.xpose.msk.msra.mxu0 %vm149_vm2, %v2431_v51  ;;  %4399 = vmatprep.mubr.msk.f32.mxu1 %vm4827_vm1, %v4824_v10 }
 0xc3b   :  { %4398 = vmatpush3.xpose.msk.msra.mxu1 %vm149_vm2, %v2355_v52  ;;  %4404 = vmatprep.mubr.msk.f32.mxu0 %vm4827_vm1, %v4824_v10 }
 0xc3c   :  { %4407 = vmatprep.subr.mxu1 %v4824_v10  ;;  %4412 = vmatprep.subr.mxu0 %v4824_v10 }
 0xc3d   :  { %4405 = vmatmul.mubr.msk.f32.vlgmr.msra.gmra.mrb[24].mxu0 %vm149_vm2, %v5119_v44 }
 0xc3e   :  { %4400 = vmatmul.mubr.msk.f32.vlgmr.msra.gmra.mrb[28].mxu1 %vm149_vm2, %v5127_v47  ;;  %v2507_v53 = vpop.permute.xlu1 %2506  ;;  %4414 = vmatprep.mubr.msk.f32.mxu0 %vm4827_vm1, %v4824_v10 }
 0xc3f   :  { %4408 = vmatpush3.xpose.msk.msra.mxu1 %vm149_vm2, %v2507_v53  ;;  %4409 = vmatprep.mubr.msk.f32.mxu1 %vm4827_vm1, %v4824_v10 }
 0xc40   :  { %4417 = vmatprep.subr.mxu1 %v4824_v10 }
 0xc42   :  { %4410 = vmatmul.mubr.msk.f32.vlgmr.msra.gmra.mrb[30].mxu1 %vm149_vm2, %v5137_v48 }
 0xc43   :  { %4419 = vmatprep.mubr.msk.f32.mxu1 %vm4827_vm1, %v4824_v10 }
 0xc9d   :  { %v2046_v54 = vpop.f32.mrb[22].mxu1 }
 0xc9e   :  { %v2582_v55 = vmul.f32 0.35355338, %v2046_v54  ;;  %v4376_v56 = vpop.f32.mrb[23].mxu1 }
 0xca0   :  { %v2590_v57 = vsel %vm149_vm2, %v2582_v55, -inf }
 0xca1   :  { %2591 = vmax.xlane.f32.xlu0 %v2590_v57 }
 0xd08   :  { %v2122_v58 = vpop.f32.mrb[24].mxu1  ;;  %v2198_v59 = vpop.f32.mrb[20].mxu0 }
 0xd09   :  { %v2583_v60 = vmul.f32 0.35355338, %v2122_v58  ;;  %v2584_v61 = vmul.f32 0.35355338, %v2198_v59  ;;  %v4381_v7 = vpop.f32.mrb[25].mxu1  ;;  %v4386_v5 = vpop.f32.mrb[21].mxu0 }
 0xd0b   :  { %v2596_v62 = vsel %vm149_vm2, %v2584_v61, -inf  ;;  %v2593_v63 = vsel %vm149_vm2, %v2583_v60, -inf }
 0xd0c   :  { %2597 = vmax.xlane.f32.xlu0 %v2596_v62  ;;  %v2350_v0 = vpop.f32.mrb[22].mxu0  ;;  %2594 = vmax.xlane.f32.xlu1 %v2593_v63  ;;  %v2274_v1 = vpop.f32.mrb[26].mxu1 }
 0xd0d   :  { %v2586_v2 = vmul.f32 0.35355338, %v2350_v0  ;;  %v2585_v3 = vmul.f32 0.35355338, %v2274_v1  ;;  %v4391_v4 = vpop.f32.mrb[27].mxu1  ;;  %v4396_v6 = vpop.f32.mrb[23].mxu0 }
 0xd0f   :  { %v2602_v8 = vsel %vm149_vm2, %v2586_v2, -inf  ;;  %v2599_v9 = vsel %vm149_vm2, %v2585_v3, -inf }
 0xd10   :  { %v2502_v11 = vpop.f32.mrb[24].mxu0  ;;  %2603 = vmax.xlane.f32.xlu1 %v2602_v8  ;;  %2600 = vmax.xlane.f32.xlu0 %v2599_v9 }
 0xd11   :  { %v2588_v12 = vmul.f32 0.35355338, %v2502_v11  ;;  %v2426_v13 = vpop.f32.mrb[28].mxu1  ;;  %v4406_v14 = vpop.f32.mrb[25].mxu0 }
 0xd12   :  { %v2587_v15 = vmul.f32 0.35355338, %v2426_v13  ;;  %v4401_v16 = vpop.f32.mrb[29].mxu1 }
 0xd13   :  { %v2608_v17 = vsel %vm149_vm2, %v2588_v12, -inf }
 0xd14   :  { %2609 = vmax.xlane.f32.xlu1 %v2608_v17  ;;  %v2605_v20 = vsel %vm149_vm2, %v2587_v15, -inf }
 0xd15   :  { %2606 = vmax.xlane.f32.xlu0 %v2605_v20  ;;  %v2578_v21 = vpop.f32.mrb[30].mxu1 }
 0xd16   :  { %v2589_v22 = vmul.f32 0.35355338, %v2578_v21  ;;  %v4411_v23 = vpop.f32.mrb[31].mxu1 }
 0xd18   :  { %v2611_v24 = vsel %vm149_vm2, %v2589_v22, -inf }
 0xd19   :  { %2612 = vmax.xlane.f32.xlu0 %v2611_v24 }
 0xd25   :  { %2678 = vrot.lane.b32.xlu1 %v5093_v40, %s4830_s9 }
 0xd29   :  { %2830 = vrot.lane.b32.xlu1 %v5111_v42, %s4830_s9 }
 0xd2d   :  { %2906 = vrot.lane.b32.xlu1 %v5121_v45, %s4830_s9 }
 0xd2e   :  { %v2592_v25 = vpop.xlane.xlu0 %2591 }
 0xd2f   :  { %2754 = vrot.lane.b32.xlu0 %v5113_v43, %s4830_s9  ;;  %v2614_v26 = vsub.f32 %v2582_v55, %v2592_v25 }
 0xd31   :  { %3058 = vrot.lane.b32.xlu1 %v5127_v47, %s4830_s9  ;;  %v2622_v27 = vmul.f32 1.442695, %v2614_v26 }
 0xd33   :  { %2982 = vrot.lane.b32.xlu0 %v5099_v41, %s4830_s9  ;;  %4704 = vpow2.f32 %v2622_v27 }
 0xd3d   :  { %v5205_v28 = vpop.eup %4704 }
 0xd3e   :  { %v2638_v29 = vsel %vm149_vm2, %v5205_v28, 0.0 }
 0xd55   :  { %2639 = vadd.xlane.f32.xlu1 %v2638_v29 }
 0xd99   :  { %v2598_v30 = vpop.xlane.xlu0 %2597  ;;  %v2595_v31 = vpop.xlane.xlu1 %2594 }
 0xd9a   :  { %v2616_v32 = vsub.f32 %v2584_v61, %v2598_v30  ;;  %v2615_v33 = vsub.f32 %v2583_v60, %v2595_v31 }
 0xd9c   :  { %v2626_v34 = vmul.f32 1.442695, %v2616_v32  ;;  %v2624_v37 = vmul.f32 1.442695, %v2615_v33 }
 0xd9d   :  { %v2601_v38 = vpop.xlane.xlu0 %2600  ;;  %v2604_v39 = vpop.xlane.xlu1 %2603 }
 0xd9e   :  { %4706 = vpow2.f32 %v2626_v34  ;;  %v2617_v40 = vsub.f32 %v2585_v3, %v2601_v38  ;;  %v2618_v41 = vsub.f32 %v2586_v2, %v2604_v39 }
 0xd9f   :  { %4708 = vpow2.f32 %v2624_v37 }
 0xda0   :  { %v2628_v42 = vmul.f32 1.442695, %v2617_v40  ;;  %v2630_v43 = vmul.f32 1.442695, %v2618_v41  ;;  %v3316_v40 = vld [vmem:[#allocation5 + $0xc8] sm:$0xff]  ;;  %v3317_v41 = vld [vmem:[#allocation5 + $0xd0] sm:$0xff] }
 0xda1   :  { %v2610_v45 = vpop.xlane.xlu1 %2609 }
 0xda2   :  { %4710 = vpow2.f32 %v2628_v42  ;;  %v2607_v46 = vpop.xlane.xlu0 %2606  ;;  %v2620_v47 = vsub.f32 %v2588_v12, %v2610_v45  ;;  %v4582_v42 = vpack.c.bf16 %v3317_v41, %v3316_v40  ;;  %v3319_v45 = vld [vmem:[#allocation5 + $0xe0] sm:$0xff]  ;;  %v4068_v40 = vld [vmem:[#allocation5 + $0x14a] ss:$0 sm:$0xff] }
 0xda3   :  { %4712 = vpow2.f32 %v2630_v43  ;;  %v2619_v19 = vsub.f32 %v2587_v15, %v2607_v46  ;;  %v3318_v43 = vld [vmem:[#allocation5 + $0xd8] sm:$0xff] }
 0xda4   :  { %v2634_v49 = vmul.f32 1.442695, %v2620_v47  ;;  %v4586_v46 = vpack.c.bf16 %v3319_v45, %v3318_v43 }
 0xda5   :  { %v2632_v18 = vmul.f32 1.442695, %v2619_v19  ;;  %v2679_v50 = vpop.permute.xlu1 %2678 }
 0xda6   :  { %4714 = vpow2.f32 %v2634_v49  ;;  %v2613_v51 = vpop.xlane.xlu0 %2612  ;;  %4413 = vmatpush3.msra.mxu0 %v2679_v50 }
 0xda7   :  { %4716 = vpow2.f32 %v2632_v18  ;;  %v2621_v52 = vsub.f32 %v2589_v22, %v2613_v51  ;;  %4422 = vmatprep.subr.mxu0 %v4824_v10 }
 0xda8   :  { %v4707_v53 = vpop.eup %4706 }
 0xda9   :  { %v4709_v54 = vpop.eup %4708  ;;  %v2636_v55 = vmul.f32 1.442695, %v2621_v52  ;;  %v2644_v56 = vsel %vm149_vm2, %v4707_v53, 0.0  ;;  %v2831_v3 = vpop.permute.xlu1 %2830 }
 0xdaa   :  { %v2755_v57 = vpop.permute.xlu0 %2754  ;;  %2645 = vadd.xlane.f32.xlu1 %v2644_v56  ;;  %v2641_v58 = vsel %vm149_vm2, %v4709_v54, 0.0 }
 0xdab   :  { %4718 = vpow2.f32 %v2636_v55  ;;  %4418 = vmatpush3.msra.mxu1 %v2755_v57  ;;  %2642 = vadd.xlane.f32.xlu0 %v2641_v58 }
 0xdac   :  { %v4711_v59 = vpop.eup %4710  ;;  %4427 = vmatprep.subr.mxu1 %v4824_v10 }
 0xdad   :  { %v4713_v60 = vpop.eup %4712  ;;  %v2647_v61 = vsel %vm149_vm2, %v4711_v59, 0.0  ;;  %v2907_v4 = vpop.permute.xlu1 %2906 }
 0xdae   :  { %v2650_v7 = vsel %vm149_vm2, %v4713_v60, 0.0 }
 0xdaf   :  { %2648 = vadd.xlane.f32.xlu0 %v2647_v61  ;;  %2651 = vadd.xlane.f32.xlu1 %v2650_v7 }
 0xdb0   :  { %v4715_v5 = vpop.eup %4714 }
 0xdb1   :  { %v4717_v62 = vpop.eup %4716  ;;  %v2656_v63 = vsel %vm149_vm2, %v4715_v5, 0.0  ;;  %v3059_v6 = vpop.permute.xlu1 %3058 }
 0xdb2   :  { %v2653_v0 = vsel %vm149_vm2, %v4717_v62, 0.0 }
 0xdb3   :  { %2654 = vadd.xlane.f32.xlu0 %v2653_v0  ;;  %2657 = vadd.xlane.f32.xlu1 %v2656_v63 }
 0xdb5   :  { %v5217_v1 = vpop.eup %4718 }
 0xdb6   :  { %v2659_v2 = vsel %vm149_vm2, %v5217_v1, 0.0 }
 0xdb7   :  { %2660 = vadd.xlane.f32.xlu0 %v2659_v2 }
 0xdc4   :  { %3210 = vrot.lane.b32.xlu1 %v5137_v48, %s4830_s9  ;;  %v2983_v48 = vpop.permute.xlu0 %2982 }
 0xdcd   :  { %3134 = vrot.lane.b32.xlu0 %v5119_v44, %s4830_s9 }
 0xde2   :  { %v2640_v8 = vpop.xlane.xlu1 %2639 }
 0xde3   :  { %4720 = vrcp.f32 %v2640_v8 }
 0xded   :  { %v4721_v9 = vpop.eup %4720 }
 0xdee   :  { %v2670_v11 = vmul.f32 %v4721_v9, %v5205_v28 }
 0xdf0   :  { %4415 = vmatmul.mubr.msk.f32.vlgmr.msra.gmra.mrb[26].mxu0 %vm149_vm2, %v2670_v11 }
 0xdf1   :  { %4423 = vmatpush3.msra.mxu0 %v2831_v3  ;;  %4424 = vmatprep.mubr.msk.f32.mxu0 %vm4827_vm1, %v4824_v10 }
 0xdf2   :  { %4432 = vmatprep.subr.mxu0 %v4824_v10 }
 0xe37   :  { %v2646_v12 = vpop.xlane.xlu1 %2645 }
 0xe38   :  { %v2643_v13 = vpop.xlane.xlu0 %2642  ;;  %4722 = vrcp.f32 %v2646_v12 }
 0xe39   :  { %4724 = vrcp.f32 %v2643_v13 }
 0xe3c   :  { %v2649_v44 = vpop.xlane.xlu0 %2648  ;;  %v2652_v14 = vpop.xlane.xlu1 %2651 }
 0xe3d   :  { %4726 = vrcp.f32 %v2649_v44 }
 0xe3e   :  { %4728 = vrcp.f32 %v2652_v14 }
 0xe40   :  { %v2655_v15 = vpop.xlane.xlu0 %2654  ;;  %v2658_v16 = vpop.xlane.xlu1 %2657 }
 0xe41   :  { %4730 = vrcp.f32 %v2655_v15 }
 0xe42   :  { %v4723_v17 = vpop.eup %4722  ;;  %4732 = vrcp.f32 %v2658_v16 }
 0xe43   :  { %v4725_v20 = vpop.eup %4724  ;;  %v2672_v21 = vmul.f32 %v4723_v17, %v4707_v53 }
 0xe44   :  { %v2671_v22 = vmul.f32 %v4725_v20, %v4709_v54  ;;  %v2661_v23 = vpop.xlane.xlu0 %2660  ;;  %v3211_v33 = vpop.permute.xlu1 %3210 }
 0xe45   :  { %4734 = vrcp.f32 %v2661_v23  ;;  %4425 = vmatmul.mubr.msk.f32.vlgmr.msra.gmra.mrb[28].mxu0 %vm149_vm2, %v2672_v21 }
 0xe46   :  { %4420 = vmatmul.mubr.msk.f32.vlgmr.msra.gmra.mrb[32].mxu1 %vm149_vm2, %v2671_v22  ;;  %4433 = vmatpush3.msra.mxu0 %v2983_v48 }
 0xe47   :  { %v4727_v24 = vpop.eup %4726  ;;  %4428 = vmatpush3.msra.mxu1 %v2907_v4  ;;  %4429 = vmatprep.mubr.msk.f32.mxu1 %vm4827_vm1, %v4824_v10 }
 0xe48   :  { %v4729_v25 = vpop.eup %4728  ;;  %v2673_v26 = vmul.f32 %v4727_v24, %v4711_v59  ;;  %4434 = vmatprep.mubr.msk.f32.mxu0 %vm4827_vm1, %v4824_v10  ;;  %4437 = vmatprep.subr.mxu1 %v4824_v10  ;;  %v3135_v28 = vpop.permute.xlu0 %3134 }
 0xe49   :  { %v2674_v27 = vmul.f32 %v4729_v25, %v4713_v60  ;;  %4442 = vmatprep.subr.mxu0 %v4824_v10 }
 0xe4a   :  { %4430 = vmatmul.mubr.msk.f32.vlgmr.msra.gmra.mrb[34].mxu1 %vm149_vm2, %v2673_v26  ;;  %v3449_v26 = vld [vmem:[#allocation5 + $0xf0] sm:$0xff] }
 0xe4b   :  { %v4731_v29 = vpop.eup %4730  ;;  %4435 = vmatmul.mubr.msk.f32.vlgmr.msra.gmra.mrb[30].mxu0 %vm149_vm2, %v2674_v27  ;;  %4438 = vmatpush3.msra.mxu1 %v3059_v6  ;;  %v4065_v6 = vld [vmem:[#allocation5 + $0x149] ss:$0 sm:$0xff] }
 0xe4c   :  { %v4733_v30 = vpop.eup %4732  ;;  %v2675_v31 = vmul.f32 %v4731_v29, %v4717_v62  ;;  %4443 = vmatpush3.msra.mxu0 %v3135_v28  ;;  %4439 = vmatprep.mubr.msk.f32.mxu1 %vm4827_vm1, %v4824_v10  ;;  %v3450_v28 = vld [vmem:[#allocation5 + $0xf8] sm:$0xff]  ;;  %v3451_v29 = vld [vmem:[#allocation5 + $0x100] sm:$0xff] }
 0xe4d   :  { %v2676_v32 = vmul.f32 %v4733_v30, %v4715_v5  ;;  %4444 = vmatprep.mubr.msk.f32.mxu0 %vm4827_vm1, %v4824_v10  ;;  %4447 = vmatprep.subr.mxu1 %v4824_v10  ;;  %v4594_v30 = vpack.c.bf16 %v3451_v29, %v3450_v28 }
 0xe4e   :  { %4440 = vmatmul.mubr.msk.f32.vlgmr.msra.gmra.mrb[36].mxu1 %vm149_vm2, %v2675_v31  ;;  %4583 = vmatprep.subr.bf16.mxu0 %v4582_v42 }
 0xe4f   :  { %v4735_v34 = vpop.eup %4734  ;;  %4445 = vmatmul.mubr.msk.f32.vlgmr.msra.gmra.mrb[32].mxu0 %vm149_vm2, %v2676_v32  ;;  %4448 = vmatpush3.msra.mxu1 %v3211_v33 }
 0xe50   :  { %v2677_v37 = vmul.f32 %v4735_v34, %v5217_v1  ;;  %4449 = vmatprep.mubr.msk.f32.mxu1 %vm4827_vm1, %v4824_v10  ;;  %4585 = vmatpush3.bf16.msra.mxu0 %v4582_v42  ;;  %v4069_v42 = vld [vmem:[#allocation5 + $0x14b] ss:$0 sm:$0xff] }
 0xe51   :  { %4587 = vmatprep.subr.bf16.mxu0 %v4586_v46 }
 0xe52   :  { %4450 = vmatmul.mubr.msk.f32.vlgmr.msra.gmra.mrb[38].mxu1 %vm149_vm2, %v2677_v37 }
 0xe54   :  { %4589 = vmatpush3.bf16.msra.mxu0 %v4586_v46 }
 0xec3   :  { %v2750_v38 = vpop.f32.mrb[26].mxu0 }
 0xec4   :  { %v4416_v39 = vpop.f32.mrb[27].mxu0 }
 0xf18   :  { %v2902_v47 = vpop.f32.mrb[28].mxu0 }
 0xf19   :  { %v2826_v19 = vpop.f32.mrb[32].mxu1  ;;  %3291 = vrot.lane.b32.xlu1 %v2902_v47, %s4831_s10  ;;  %v4426_v49 = vpop.f32.mrb[29].mxu0 }
 0xf1a   :  { %3287 = vrot.lane.b32.xlu0 %v2826_v19, %s4822_s20  ;;  %v4421_v10 = vpop.f32.mrb[33].mxu1 }
 0xf1b   :  { %v3556_v10 = vld [vmem:[#allocation5 + $0x108] sm:$0xff] }
 0xf1d   :  { %v2978_v18 = vpop.f32.mrb[34].mxu1 }
 0xf1e   :  { %v3054_v50 = vpop.f32.mrb[30].mxu0  ;;  %v4431_v51 = vpop.f32.mrb[35].mxu1  ;;  %3295 = vrot.lane.b32.xlu1 %v2978_v18, %s4832_s11  ;;  %v3557_v18 = vld [vmem:[#allocation5 + $0x110] sm:$0xff] }
 0xf1f   :  { %v4436_v52 = vpop.f32.mrb[31].mxu0  ;;  %v4598_v51 = vpack.c.bf16 %v3557_v18, %v3556_v10 }
 0xf20   :  { %v3559_v52 = vld [vmem:[#allocation5 + $0x120] sm:$0xff] }
 0xf21   :  { %v3130_v53 = vpop.f32.mrb[36].mxu1  ;;  %4599 = vmatprep.subr.bf16.mxu0 %v4598_v51 }
 0xf22   :  { %v3206_v54 = vpop.f32.mrb[32].mxu0  ;;  %3302 = vrot.lane.b32.xlu0 %v3130_v53, %s4822_s20  ;;  %v4441_v55 = vpop.f32.mrb[37].mxu1 }
 0xf23   :  { %v4446_v56 = vpop.f32.mrb[33].mxu0  ;;  %v3561_v55 = vld [vmem:[#allocation5 + $0x130] sm:$0xff] }
 0xf25   :  { %v3282_v57 = vpop.f32.mrb[38].mxu1 }
 0xf26   :  { %3306 = vrot.lane.b32.xlu0 %v3206_v54, %s4831_s10  ;;  %3310 = vrot.lane.b32.xlu1 %v3282_v57, %s4832_s11  ;;  %v4451_v58 = vpop.f32.mrb[39].mxu1  ;;  %v3560_v54 = vld [vmem:[#allocation5 + $0x128] sm:$0xff]  ;;  %v3562_v57 = vld [vmem:[#allocation5 + $0x138] sm:$0xff] }
 0xf27   :  { %v4606_v56 = vpack.c.bf16 %v3561_v55, %v3560_v54  ;;  %v3563_v58 = vld [vmem:[#allocation5 + $0x140] sm:$0xff]  ;;  %v4076_v54 = vld [vmem:[#allocation5 + $0x14e] ss:$0 sm:$0xff] }
 0xf8b   :  { %v3292_v59 = vpop.permute.xlu1 %3291 }
 0xf8c   :  { %v3288_v60 = vpop.permute.xlu0 %3287 }
 0xf8d   :  { %v3298_v61 = vsel %vm149_vm2, %v2750_v38, %v3288_v60  ;;  %v4070_v60 = vld [vmem:[#allocation5 + $0x14c] ss:$0 sm:$0xff] }
 0xf8e   :  { %v3299_v7 = vsel %vm1473_vm3, %v3298_v61, %v3292_v59  ;;  %v4610_v59 = vpack.c.bf16 %v3563_v58, %v3562_v57  ;;  %v4077_v58 = vld [vmem:[#allocation5 + $0x14f] ss:$0 sm:$0xff] }
 0xf90   :  { %v3296_v5 = vpop.permute.xlu1 %3295 }
 0xf91   :  { %v3300_v62 = vsel %vm1475_vm4, %v3299_v7, %v3296_v5 }
 0xf92   :  { %4460 = vmatprep.mubr.msk.f32.mxu0 %vm51_vm0, %v3300_v62 }
 0xf94   :  { %v3303_v63 = vpop.permute.xlu0 %3302 }
 0xf95   :  { %v3313_v0 = vsel %vm149_vm2, %v3054_v50, %v3303_v63  ;;  %v3558_v50 = vld [vmem:[#allocation5 + $0x118] sm:$0xff] }
 0xf96   :  { %v4602_v53 = vpack.c.bf16 %v3559_v52, %v3558_v50 }
 0xf98   :  { %v3307_v1 = vpop.permute.xlu0 %3306  ;;  %v3311_v2 = vpop.permute.xlu1 %3310 }
 0xf99   :  { %v3314_v3 = vsel %vm1473_vm3, %v3313_v0, %v3307_v1 }
 0xf9a   :  { %v3315_v4 = vsel %vm1475_vm4, %v3314_v3, %v3311_v2 }
 0xf9b   :  { %4461 = vmatmul.mubr.msk.f32.vlgmr.msra.gmra.mrb[34].mxu0 %vm51_vm0, %v3315_v4 }
 0xf9c   :  { %4601 = vmatpush3.bf16.msra.mxu0 %v4598_v51 }
 0xf9d   :  { %4603 = vmatprep.subr.bf16.mxu0 %v4602_v53 }
 0xfa0   :  { %4605 = vmatpush3.bf16.msra.mxu0 %v4602_v53 }
 0xfa1   :  { %4607 = vmatprep.subr.bf16.mxu0 %v4606_v56 }
 0xfa4   :  { %4609 = vmatpush3.bf16.msra.mxu0 %v4606_v56 }
 0xfa5   :  { %4611 = vmatprep.subr.bf16.mxu0 %v4610_v59 }
 0xfa8   :  { %4613 = vmatpush3.bf16.msra.mxu0 %v4610_v59 }
0x106e   :  { %v4462_v8 = vpop.f32.mrb[34].mxu0 }
0x106f   :  { %v3403_v9 = vadd.f32 %v4462_v8, %v4065_v6  ;;  %v3397_v11 = vpop.f32.mrb[35].mxu0 }
0x1070   :  { %v3398_v48 = vadd.f32 %v4065_v6, %v3397_v11 }
0x1071   :  { %v3407_v12 = vadd.f32 %v3403_v9, %v5085_v36 }
0x1072   :  { %v3406_v13 = vadd.f32 %v3398_v48, %v5083_v35  ;;  %v3448_v35 = vld [vmem:[#allocation5 + $0xe8] sm:$0xff] }
0x1073   :  { %v3413_v44 = vsel %vm51_vm0, %v3407_v12, 0.0  ;;  %v4590_v27 = vpack.c.bf16 %v3449_v26, %v3448_v35 }
0x1074   :  { %3414 = vadd.xlane.f32.xlu1 %v3413_v44  ;;  %v3410_v14 = vsel %vm51_vm0, %v3406_v13, 0.0 }
0x1075   :  { %3411 = vadd.xlane.f32.xlu0 %v3410_v14  ;;  %4591 = vmatprep.subr.bf16.mxu1 %v4590_v27 }
0x1076   :  { %4593 = vmatpush3.bf16.msra.mxu1 %v4590_v27 }
0x1077   :  { %4595 = vmatprep.subr.bf16.mxu1 %v4594_v30 }
0x107a   :  { %4597 = vmatpush3.bf16.msra.mxu1 %v4594_v30 }
0x1101   :  { %v3415_v15 = vpop.xlane.xlu1 %3414 }
0x1102   :  { %v3417_v16 = vmul.f32 0.03125, %v3415_v15  ;;  %v3412_v17 = vpop.xlane.xlu0 %3411 }
0x1103   :  { %v3416_v20 = vmul.f32 0.03125, %v3412_v17 }
0x1104   :  { %v3419_v21 = vsub.f32 %v3407_v12, %v3417_v16 }
0x1105   :  { %v3418_v22 = vsub.f32 %v3406_v13, %v3416_v20  ;;  %v4073_v20 = vld [vmem:[#allocation5 + $0x14d] ss:$0 sm:$0xff] }
0x1106   :  { %v3421_v25 = vmul.f32 %v3419_v21, %v3419_v21 }
0x1107   :  { %v3420_v23 = vmul.f32 %v3418_v22, %v3418_v22 }
0x1108   :  { %v3425_v36 = vsel %vm51_vm0, %v3421_v25, 0.0 }
0x1109   :  { %v3422_v24 = vsel %vm51_vm0, %v3420_v23, 0.0 }
0x110a   :  { %3423 = vadd.xlane.f32.xlu0 %v3422_v24 }
0x110e   :  { %3426 = vadd.xlane.f32.xlu0 %v3425_v36 }
0x1197   :  { %v3424_v31 = vpop.xlane.xlu0 %3423 }
0x1198   :  { %v3428_v32 = vmul.f32 0.03125, %v3424_v31 }
0x119a   :  { %v3430_v33 = vadd.f32 1e-12, %v3428_v32 }
0x119b   :  { %v3427_v34 = vpop.xlane.xlu0 %3426 }
0x119c   :  { %4736 = vrsqrt.f32 %v3430_v33  ;;  %v3429_v37 = vmul.f32 0.03125, %v3427_v34 }
0x119e   :  { %v3431_v38 = vadd.f32 1e-12, %v3429_v37 }
0x11a0   :  { %4738 = vrsqrt.f32 %v3431_v38 }
0x11a6   :  { %v4737_v39 = vpop.eup %4736 }
0x11a7   :  { %v3434_v41 = vmul.f32 %v4737_v39, %v3418_v22  ;;  %v3692_v39 = vld [vmem:[#allocation5 + $0x150] sm:$0xff] }
0x11a9   :  { %v3440_v43 = vmul.f32 %v4068_v40, %v3434_v41 }
0x11aa   :  { %v4739_v45 = vpop.eup %4738 }
0x11ab   :  { %v3435_v46 = vmul.f32 %v4739_v45, %v3419_v21  ;;  %v3446_v47 = vadd.f32 %v4069_v42, %v3440_v43  ;;  %v3695_v43 = vld [vmem:[#allocation5 + $0x168] sm:$0xff] }
0x11ad   :  { %v3441_v19 = vmul.f32 %v4068_v40, %v3435_v46  ;;  %4471 = vmatprep.mubr.msk.f32.mxu1 %vm51_vm0, %v3446_v47  ;;  %v3693_v40 = vld [vmem:[#allocation5 + $0x158] sm:$0xff]  ;;  %v3788_v46 = vld [vmem:[#allocation5 + $0x170] sm:$0xff] }
0x11ae   :  { %v4614_v41 = vpack.c.bf16 %v3693_v40, %v3692_v39 }
0x11af   :  { %v3447_v49 = vadd.f32 %v4069_v42, %v3441_v19  ;;  %v3694_v42 = vld [vmem:[#allocation5 + $0x160] sm:$0xff] }
0x11b0   :  { %v4618_v45 = vpack.c.bf16 %v3695_v43, %v3694_v42  ;;  %4615 = vmatprep.subr.bf16.mxu1 %v4614_v41 }
0x11b1   :  { %4472 = vmatmul.mubr.msk.f32.vlgmr.msra.gmra.mrb[40].mxu1 %vm51_vm0, %v3447_v49 }
0x11b2   :  { %4617 = vmatpush3.bf16.msra.mxu1 %v4614_v41 }
0x11b3   :  { %4619 = vmatprep.subr.bf16.mxu1 %v4618_v45 }
0x11b6   :  { %4621 = vmatpush3.bf16.msra.mxu1 %v4618_v45 }
0x1284   :  { %v4473_v61 = vpop.f32.mrb[40].mxu1 }
0x1285   :  { %v3535_v7 = vadd.f32 %v4473_v61, %v4070_v60  ;;  %v3529_v5 = vpop.f32.mrb[41].mxu1  ;;  %v3790_v61 = vld [vmem:[#allocation5 + $0x180] sm:$0xff] }
0x1286   :  { %v3530_v62 = vadd.f32 %v4070_v60, %v3529_v5 }
0x1287   :  { %v3541_v63 = vmul.f32 0.044715, %v3535_v7  ;;  %v3539_v15 = vmul.f32 0.5, %v3535_v7 }
0x1288   :  { %v3540_v0 = vmul.f32 0.044715, %v3530_v62  ;;  %v3538_v44 = vmul.f32 0.5, %v3530_v62 }
0x1289   :  { %v3543_v1 = vmul.f32 %v3541_v63, %v3535_v7 }
0x128a   :  { %v3542_v2 = vmul.f32 %v3540_v0, %v3530_v62  ;;  %v3792_v0 = vld [vmem:[#allocation5 + $0x190] sm:$0xff] }
0x128b   :  { %v3545_v3 = vmul.f32 %v3543_v1, %v3535_v7  ;;  %v3793_v1 = vld [vmem:[#allocation5 + $0x198] sm:$0xff] }
0x128c   :  { %v3544_v4 = vmul.f32 %v3542_v2, %v3530_v62  ;;  %v4630_v2 = vpack.c.bf16 %v3793_v1, %v3792_v0 }
0x128d   :  { %v3547_v6 = vadd.f32 %v3545_v3, %v3535_v7  ;;  %v3791_v7 = vld [vmem:[#allocation5 + $0x188] sm:$0xff]  ;;  %v3794_v3 = vld [vmem:[#allocation5 + $0x1a0] sm:$0xff] }
0x128e   :  { %v3546_v8 = vadd.f32 %v3544_v4, %v3530_v62  ;;  %v4626_v63 = vpack.c.bf16 %v3791_v7, %v3790_v61  ;;  %v3795_v4 = vld [vmem:[#allocation5 + $0x1a8] sm:$0xff] }
0x128f   :  { %v3549_v9 = vmul.f32 0.7978846, %v3547_v6  ;;  %v4634_v6 = vpack.c.bf16 %v3795_v4, %v3794_v3 }
0x1290   :  { %v3548_v11 = vmul.f32 0.7978846, %v3546_v8  ;;  %v4078_v8 = vld [vmem:[#allocation5 + $0x1d0] ss:$0 sm:$0xff] }
0x1291   :  { %4740 = vtanh.f32 %v3549_v9 }
0x1292   :  { %4742 = vtanh.f32 %v3548_v11 }
0x129b   :  { %v4741_v48 = vpop.eup %4740 }
0x129c   :  { %v4743_v12 = vpop.eup %4742  ;;  %v3553_v13 = vadd.f32 1.0, %v4741_v48 }
0x129d   :  { %v3552_v14 = vadd.f32 1.0, %v4743_v12 }
0x129e   :  { %v3555_v17 = vmul.f32 %v3553_v13, %v3539_v15 }
0x129f   :  { %v3554_v16 = vmul.f32 %v3552_v14, %v3538_v44 }
0x12a1   :  { %4490 = vmatprep.mubr.msk.f32.mxu0 %vm1746_vm5, %v3554_v16  ;;  %v3888_v16 = vld [vmem:[#allocation5 + $0x1b0] sm:$0xff] }
0x12a2   :  { %4491 = vmatmul.mubr.msk.f32.vlgmr.msra.gmra.mrb[36].mxu0 %vm1746_vm5, %v3555_v17  ;;  %v3889_v17 = vld [vmem:[#allocation5 + $0x1b8] sm:$0xff] }
0x1375   :  { %v4492_v21 = vpop.f32.mrb[36].mxu0 }
0x1376   :  { %v3647_v22 = vadd.f32 %v4492_v21, %v4073_v20  ;;  %v3641_v23 = vpop.f32.mrb[37].mxu0  ;;  %v3890_v21 = vld [vmem:[#allocation5 + $0x1c0] sm:$0xff] }
0x1377   :  { %v3642_v24 = vadd.f32 %v4073_v20, %v3641_v23  ;;  %v4638_v20 = vpack.c.bf16 %v3889_v17, %v3888_v16 }
0x1378   :  { %v3651_v25 = vadd.f32 %v3647_v22, %v3447_v49  ;;  %v3891_v22 = vld [vmem:[#allocation5 + $0x1c8] sm:$0xff] }
0x1379   :  { %v3650_v36 = vadd.f32 %v3642_v24, %v3446_v47  ;;  %v3789_v47 = vld [vmem:[#allocation5 + $0x178] sm:$0xff]  ;;  %4639 = vmatprep.subr.bf16.mxu0 %v4638_v20  ;;  %v4642_v23 = vpack.c.bf16 %v3891_v22, %v3890_v21  ;;  %v4081_v24 = vld [vmem:[#allocation5 + $0x1d1] ss:$0 sm:$0xff] }
0x137a   :  { %v3657_v35 = vsel %vm51_vm0, %v3651_v25, 0.0  ;;  %v4622_v19 = vpack.c.bf16 %v3789_v47, %v3788_v46  ;;  %4641 = vmatpush3.bf16.msra.mxu0 %v4638_v20 }
0x137b   :  { %3658 = vadd.xlane.f32.xlu0 %v3657_v35  ;;  %v3654_v26 = vsel %vm51_vm0, %v3650_v36, 0.0  ;;  %4643 = vmatprep.subr.bf16.mxu0 %v4642_v23 }
0x137c   :  { %3655 = vadd.xlane.f32.xlu1 %v3654_v26  ;;  %4623 = vmatprep.subr.bf16.mxu1 %v4622_v19 }
0x137e   :  { %4645 = vmatpush3.bf16.msra.mxu0 %v4642_v23 }
0x1408   :  { %v3659_v27 = vpop.xlane.xlu0 %3658 }
0x1409   :  { %v3661_v28 = vmul.f32 0.03125, %v3659_v27  ;;  %v3656_v29 = vpop.xlane.xlu1 %3655 }
0x140a   :  { %v3660_v30 = vmul.f32 0.03125, %v3656_v29 }
0x140b   :  { %v3663_v31 = vsub.f32 %v3651_v25, %v3661_v28 }
0x140c   :  { %v3662_v32 = vsub.f32 %v3650_v36, %v3660_v30 }
0x140d   :  { %v3665_v33 = vmul.f32 %v3663_v31, %v3663_v31 }
0x140e   :  { %v3664_v34 = vmul.f32 %v3662_v32, %v3662_v32 }
0x140f   :  { %v3669_v37 = vsel %vm51_vm0, %v3665_v33, 0.0 }
0x1410   :  { %3670 = vadd.xlane.f32.xlu0 %v3669_v37  ;;  %v3666_v38 = vsel %vm51_vm0, %v3664_v34, 0.0 }
0x1411   :  { %3667 = vadd.xlane.f32.xlu1 %v3666_v38 }
0x149d   :  { %v3671_v49 = vpop.xlane.xlu0 %3670 }
0x149e   :  { %v3673_v10 = vmul.f32 0.03125, %v3671_v49  ;;  %v3668_v18 = vpop.xlane.xlu1 %3667 }
0x149f   :  { %v3672_v50 = vmul.f32 0.03125, %v3668_v18 }
0x14a0   :  { %v3675_v51 = vadd.f32 1e-12, %v3673_v10 }
0x14a1   :  { %v3674_v52 = vadd.f32 1e-12, %v3672_v50 }
0x14a2   :  { %4744 = vrsqrt.f32 %v3675_v51 }
0x14a3   :  { %4746 = vrsqrt.f32 %v3674_v52 }
0x14ac   :  { %v4745_v53 = vpop.eup %4744 }
0x14ad   :  { %v4747_v55 = vpop.eup %4746  ;;  %v3679_v56 = vmul.f32 %v4745_v53, %v3663_v31  ;;  %v4084_v31 = vld [vmem:[#allocation5 + $0x1d2] ss:$0 sm:$0xff] }
0x14ae   :  { %v3678_v57 = vmul.f32 %v4747_v55, %v3662_v32 }
0x14af   :  { %v3685_v59 = vmul.f32 %v4076_v54, %v3679_v56 }
0x14b0   :  { %v3684_v60 = vmul.f32 %v4076_v54, %v3678_v57 }
0x14b1   :  { %v3691_v62 = vadd.f32 %v4077_v58, %v3685_v59 }
0x14b2   :  { %v3690_v5 = vadd.f32 %v4077_v58, %v3684_v60 }
0x14b4   :  { %4501 = vmatprep.mubr.msk.f32.mxu1 %vm51_vm0, %v3690_v5 }
0x14b5   :  { %4502 = vmatmul.mubr.msk.f32.vlgmr.msra.gmra.mrb[42].mxu1 %vm51_vm0, %v3691_v62 }
0x14b6   :  { %4625 = vmatpush3.bf16.msra.mxu1 %v4622_v19 }
0x14b7   :  { %4627 = vmatprep.subr.bf16.mxu1 %v4626_v63 }
0x14ba   :  { %4629 = vmatpush3.bf16.msra.mxu1 %v4626_v63 }
0x14bb   :  { %4631 = vmatprep.subr.bf16.mxu1 %v4630_v2 }
0x14be   :  { %4633 = vmatpush3.bf16.msra.mxu1 %v4630_v2 }
0x14bf   :  { %4635 = vmatprep.subr.bf16.mxu1 %v4634_v6 }
0x14c2   :  { %4637 = vmatpush3.bf16.msra.mxu1 %v4634_v6 }
0x1588   :  { %v4503_v9 = vpop.f32.mrb[42].mxu1 }
0x1589   :  { %v3779_v11 = vadd.f32 %v4503_v9, %v4078_v8  ;;  %v3773_v48 = vpop.f32.mrb[43].mxu1 }
0x158a   :  { %v3774_v12 = vadd.f32 %v4078_v8, %v3773_v48 }
0x158b   :  { %v3785_v13 = vmul.f32 0.01, %v3779_v11  ;;  %vm3783_vm6 = vcmp.gt.f32.partialorder %v3779_v11, 0.0 }
0x158c   :  { %vm3782_vm7 = vcmp.gt.f32.partialorder %v3774_v12, 0.0  ;;  %v3784_v44 = vmul.f32 0.01, %v3774_v12 }
0x158d   :  { %v3787_v15 = vsel %vm3783_vm6, %v3779_v11, %v3785_v13 }
0x158e   :  { %v3786_v14 = vsel %vm3782_vm7, %v3774_v12, %v3784_v44 }
0x158f   :  { %4520 = vmatprep.mubr.msk.f32.mxu1 %vm1746_vm5, %v3786_v14 }
0x1590   :  { %4521 = vmatmul.mubr.msk.f32.vlgmr.msra.gmra.mrb[44].mxu1 %vm1746_vm5, %v3787_v15 }
0x1663   :  { %v4522_v25 = vpop.f32.mrb[44].mxu1 }
0x1664   :  { %v3879_v36 = vadd.f32 %v4522_v25, %v4081_v24  ;;  %v3873_v35 = vpop.f32.mrb[45].mxu1 }
0x1665   :  { %v3874_v26 = vadd.f32 %v4081_v24, %v3873_v35 }
0x1666   :  { %v3885_v27 = vmul.f32 0.01, %v3879_v36  ;;  %vm3883_vm8 = vcmp.gt.f32.partialorder %v3879_v36, 0.0 }
0x1667   :  { %vm3882_vm9 = vcmp.gt.f32.partialorder %v3874_v26, 0.0  ;;  %v3884_v28 = vmul.f32 0.01, %v3874_v26 }
0x1668   :  { %v3887_v30 = vsel %vm3883_vm8, %v3879_v36, %v3885_v27 }
0x1669   :  { %v3886_v29 = vsel %vm3882_vm9, %v3874_v26, %v3884_v28 }
0x166a   :  { %4531 = vmatprep.mubr.msk.f32.mxu0 %vm51_vm0, %v3886_v29 }
0x166b   :  { %4532 = vmatmul.mubr.msk.f32.vlgmr.msra.gmra.mrb[38].mxu0 %vm51_vm0, %v3887_v30 }
0x173e   :  { %v4533_v32 = vpop.f32.mrb[38].mxu0 }
0x173f   :  { %v3975_v33 = vadd.f32 %v4533_v32, %v4084_v31  ;;  %v3969_v34 = vpop.f32.mrb[39].mxu0 }
0x1740   :  { %v3970_v37 = vadd.f32 %v4084_v31, %v3969_v34 }
0x1741   :  { %3979 = vst.msk [vmem:[#allocation7 + $0x8] sm:$0xff] %vm1473_vm3, %v3975_v33 }
0x1742   :  { %3978 = vst.msk [vmem:[#allocation7] sm:$0xff] %vm1473_vm3, %v3970_v37 }
0x1743   :  { %4803 = shalt.err (!%p4800_p6)
}
0x1744   :  { %s4804_s17 = scalar_lea.hbm %s5304_s2, 256 }
0x1745   :  { %p4805_p7 = scmp.ne.s32.totalorder %s5304_s2, %s4804_s17  ;;  %p4808_p8 = scmp.lt.u32.totalorder %s4804_s17, %s5304_s2 }
0x1747   :  { %p4810_p9 = pnand %p4808_p8, %p4805_p7 }
0x1749   :  { %4813 = shalt.err (!%p4810_p9)
}
0x174a   :  { %3991 = dma.vmem_to_hbm [thread:$0]  %s3986_s13, 256, %s5304_s2, [#allocation4], %s4821_s19, %s4821_s19, %s4822_s20  }
0x174b   :  { %4818 = dma.done.wait [#allocation4], 256  }
0x174c   :  { %4819 = vsyncadd [#allocation4], 4294967040 }
0x174d   :  { %3995 = vsyncpa [#allocation3], 1 }
0x174e   :  { %3996 = vsyncpa [#allocation6], 1 }
0x174f   :  { %3997 = vsyncpa [#allocation4], 1 }

</bundles_post_ra>
